<compile_context>
chip_gen: v7x
topology: tpu7x:2x2x1
jax: 0.10.0
libtpu: 0.0.40
codegen_flags: <defaults>
</compile_context>

<pallas_src>
import numpy as np
import jax
import jax.numpy as jnp
from jax import lax
from jax.experimental import pallas as pl
from jax.experimental.pallas import tpu as pltpu


def _round_up(x: int, m: int) -> int:
    return ((x + m - 1) // m) * m


def make_esn_recurrence_kernel(alpha: float, chunk: int, tail: int,
                               num_chunks: int, unroll: int):
    """Leaky-tanh ESN recurrence over one time chunk per grid iteration.

    Per step (inside a static, partially unrolled fori_loop):
        r <- r + alpha * (tanh(r @ A^T + u_t) - r)
    where u_t = x_t @ B^T + b was precomputed off the serial path.
    """
    alpha = float(alpha)

    def make_step(A_t, u_ref):
        def step(t, r):
            pre = jnp.dot(r, A_t, preferred_element_type=jnp.float32) + u_ref[t]
            # r + alpha*(tanh(pre) - r) == (1-alpha)*r + alpha*tanh(pre)
            return r + alpha * (jnp.tanh(pre) - r)
        return step

    def kernel(u_ref, r0_ref, At_ref, r_ref):
        c = pl.program_id(1)            # time-chunk axis (axis 0 = batch tile)

        # Initialize the resident reservoir state from r_0 on the first chunk
        # of every batch tile.
        @pl.when(c == 0)
        def _():
            r_ref[...] = r0_ref[...]

        A_t = At_ref[...]               # loop-invariant within the chunk
        step = make_step(A_t, u_ref)

        if tail == chunk:
            # Every chunk is full length: single static, partially unrolled loop.
            r_ref[...] = lax.fori_loop(0, chunk, step, r_ref[...],
                                       unroll=min(unroll, chunk))
        else:
            # Hot chunks: full static trip count (unrollable).
            @pl.when(c < num_chunks - 1)
            def _():
                r_ref[...] = lax.fori_loop(0, chunk, step, r_ref[...],
                                           unroll=min(unroll, chunk))

            # Final ragged chunk: its trip count (tail) is ALSO a static
            # Python int, so it stays static/unrolled; padded timesteps are
            # never executed (they are not identity steps, so this matters).
            @pl.when(c == num_chunks - 1)
            def _():
                r_ref[...] = lax.fori_loop(0, tail, step, r_ref[...],
                                           unroll=min(unroll, tail))

    return kernel


def esn_forecaster_forward(inp, r_0, A, B, bias, C, alpha,
                           time_chunk=512, unroll=8):
    """Pallas implementation of ESNForecaster.forward.

    inp : (batch, seq_len, Nu+Ns)
    r_0 : (1, batch, Nr)
    A   : (Nr, Nr)   reservoir matrix
    B   : (Nr, Nu+Ns) input matrix
    bias: (Nr,)      additive bias
    C   : (No, Nr)   readout weight (nn.Linear, bias=False)
    returns: (batch, No)
    """
    batch, seq_len, _nin = inp.shape
    nr = A.shape[0]

    # Lane / sublane aligned sizes.
    nr_p = _round_up(nr, 128)
    batch_8 = _round_up(batch, 8)
    # Cap the batch tile so the fori_loop carry (tb x nr_p f32) stays within
    # ~half the vreg file -> no per-step spill/fill on the critical path; it
    # also provides >=2 'parallel' batch tiles for v7x when batch is large.
    tb_cap = max(8, ((32768 // nr_p) // 8) * 8)
    tb = min(batch_8, tb_cap)
    batch_p = _round_up(batch_8, tb)
    nb = batch_p // tb

    # Per-generation VMEM budget -> time-chunk size + explicit scoped limit.
    try:
        vmem_cap = int(pltpu.get_tpu_info().vmem_capacity_bytes)
    except Exception:
        vmem_cap = 64 * 1024 * 1024          # conservative default (v7x)
    bytes_state = tb * nr_p * 4
    bytes_At = nr_p * nr_p * 4
    budget = int(0.6 * vmem_cap) - (bytes_At + 4 * bytes_state + (2 << 20))
    per_step = 2 * tb * nr_p * 4             # u stream is double-buffered
    max_chunk = max(8, budget // per_step)
    chunk = int(max(1, min(time_chunk, seq_len, max_chunk)))
    num_chunks = int(pl.cdiv(seq_len, chunk))
    seq_p = num_chunks * chunk
    tail = seq_len - (num_chunks - 1) * chunk  # static length of the last chunk

    x = jnp.asarray(inp, jnp.float32)
    A_f = jnp.asarray(A, jnp.float32)
    B_f = jnp.asarray(B, jnp.float32)
    b_f = jnp.asarray(bias, jnp.float32)
    C_f = jnp.asarray(C, jnp.float32)
    r0 = jnp.asarray(r_0, jnp.float32)[0]                      # (batch, Nr)

    # Hoist the input projection off the serial path: one big batched matmul,
    # emitted time-major directly (no separate transpose pass over HBM).
    u = jnp.einsum("bsi,ri->sbr", x, B_f) + b_f[None, None, :]  # (seq, batch, Nr)

    # Zero-pad to aligned shapes; padded rows/lanes stay identically zero and
    # never contaminate real lanes (padded rows/cols of A^T are zero).
    u_p = jnp.pad(u, ((0, seq_p - seq_len), (0, batch_p - batch), (0, nr_p - nr)))
    r0_p = jnp.pad(r0, ((0, batch_p - batch), (0, nr_p - nr)))
    At_p = jnp.pad(A_f.T, ((0, nr_p - nr), (0, nr_p - nr)))

    kernel = make_esn_recurrence_kernel(float(alpha), chunk, tail, num_chunks,
                                        int(unroll))

    vmem_need = (2 * chunk * tb * nr_p * 4   # u double buffer
                 + bytes_At + bytes_state    # (ideally single-buffered) invariants
                 + 2 * bytes_state)          # resident output/state block
    vmem_limit = int(min(int(0.85 * vmem_cap),
                         max(int(1.3 * vmem_need) + (4 << 20), 32 << 20)))

    def build(single_buffer_invariants: bool):
        inv_kwargs = ({"pipeline_mode": pl.Buffered(1)}
                      if single_buffer_invariants else {})
        grid_spec = pltpu.PrefetchScalarGridSpec(
            num_scalar_prefetch=0,
            grid=(nb, num_chunks),
            in_specs=[
                # Streamed time-chunk of the precomputed projection u.
                pl.BlockSpec((chunk, tb, nr_p), lambda b, c: (c, b, 0)),
                # Loop-invariant operands: single-buffered (fetched once per
                # batch tile / once total).
                pl.BlockSpec((tb, nr_p), lambda b, c: (b, 0), **inv_kwargs),
                pl.BlockSpec((nr_p, nr_p), lambda b, c: (0, 0), **inv_kwargs),
            ],
            # Constant index over the time axis -> the output block stays
            # VMEM-resident across chunks and carries the reservoir state.
            out_specs=pl.BlockSpec((tb, nr_p), lambda b, c: (b, 0)),
        )
        return pl.pallas_call(
            kernel,
            out_shape=jax.ShapeDtypeStruct((batch_p, nr_p), jnp.float32),
            grid_spec=grid_spec,
            compiler_params=pltpu.CompilerParams(
                # Batch tiles are independent recurrences (megacore-parallel on
                # v7x); the time axis is a serial recurrence.
                dimension_semantics=("parallel", "arbitrary"),
                vmem_limit_bytes=vmem_limit,
            ),
        )

    try:
        r_final = build(True)(u_p, r0_p, At_p)
    except Exception:
        # Fallback if Buffered(1) single-buffering is rejected on this
        # jax/Mosaic version; semantics identical, only VMEM usage differs.
        r_final = build(False)(u_p, r0_p, At_p)

    # Final linear readout (nn.Linear, bias=False) as one XLA matmul; the
    # kernel output stays lane-dense (nr_p wide) instead of a masked No store.
    return r_final[:batch, :nr] @ C_f.T


def reference_forward(inp, r_0, A, B, bias, C, alpha):
    """Pure-JAX reference of the same recurrence (for validation)."""
    x = jnp.transpose(jnp.asarray(inp, jnp.float32), (1, 0, 2))
    r = jnp.asarray(r_0, jnp.float32)[0]
    A_t = jnp.asarray(A, jnp.float32).T
    B_t = jnp.asarray(B, jnp.float32).T
    b = jnp.asarray(bias, jnp.float32)[None, :]
    for t in range(x.shape[0]):
        pre = r @ A_t + x[t] @ B_t + b
        r = (1.0 - alpha) * r + alpha * jnp.tanh(pre)
    return r @ jnp.asarray(C, jnp.float32).T


def init_params(Nr, Nu, Ns, No, rho_sr, rho_A, sigma, sigma_b, seed=0):
    """Deterministic synthetic init mirroring the ESN parameter shapes/scales."""
    rng = np.random.default_rng(seed)
    A = rng.uniform(-1.0, 1.0, size=(Nr, Nr))
    mask = rng.uniform(size=(Nr, Nr)) < rho_A
    A = A * mask
    eig = np.max(np.abs(np.linalg.eigvals(A)))
    if eig > 0:
        A = A * (rho_sr / eig)
    B = rng.uniform(-sigma, sigma, size=(Nr, Nu + Ns))
    bias = rng.uniform(-sigma_b, sigma_b, size=(Nr,))
    bound = 1.0 / np.sqrt(Nr)                     # nn.Linear(Nr, No, bias=False)
    C = rng.uniform(-bound, bound, size=(No, Nr))
    return (A.astype(np.float32), B.astype(np.float32),
            bias.astype(np.float32), C.astype(np.float32))


if __name__ == "__main__":
    # Small shapes consistent with the module's forward signature.
    Nr, Nu, Ns, No = 32, 3, 5, 5
    batch, seq_len = 2, 8
    alpha = 0.6

    A, B, bias, C = init_params(
        Nr, Nu, Ns, No, rho_sr=0.8, rho_A=0.02, sigma=0.084, sigma_b=1.6, seed=0
    )

    key = jax.random.PRNGKey(0)
    k1, k2 = jax.random.split(key)
    inp = jax.random.normal(k1, (batch, seq_len, Nu + Ns), dtype=jnp.float32)
    r_0 = jax.random.normal(k2, (1, batch, Nr), dtype=jnp.float32) * 0.1

    out = jax.block_until_ready(esn_forecaster_forward(inp, r_0, A, B, bias, C, alpha))
    ref = jax.block_until_ready(reference_forward(inp, r_0, A, B, bias, C, alpha))

    assert out.shape == (batch, No)
    assert np.allclose(np.asarray(out), np.asarray(ref), rtol=1e-5, atol=1e-5)

    print("KERNEL_OK")
</pallas_src>

<mosaic_0001>
module attributes {stable_mosaic.version = 11 : i64} {
  func.func @kernel(%arg0: i32, %arg1: i32, %arg2: memref<8x8x128xf32, #tpu.memory_space<vmem>>, %arg3: memref<8x128xf32, #tpu.memory_space<vmem>>, %arg4: memref<128x128xf32, #tpu.memory_space<vmem>>, %arg5: memref<8x128xf32, #tpu.memory_space<vmem>>) attributes {dimension_semantics = [#tpu.dimension_semantics<parallel>, #tpu.dimension_semantics<arbitrary>], iteration_bounds = array<i64: 1, 1>, scalar_prefetch = 0 : i64, scratch_operands = 0 : i64, tpu.core_type = #tpu.core_type<tc>, window_params = [{transform_indices = @transform_0, window_bounds = array<i64: 8, 8, 128>}, {pipeline_mode = #tpu.pipeline_mode<synchronous>, transform_indices = @transform_1, window_bounds = array<i64: 8, 128>}, {pipeline_mode = #tpu.pipeline_mode<synchronous>, transform_indices = @transform_2, window_bounds = array<i64: 128, 128>}, {transform_indices = @transform_3, window_bounds = array<i64: 8, 128>}]} {
    %c0_i32 = arith.constant 0 : i32
    %0 = arith.cmpi eq, %arg1, %c0_i32 : i32
    %1 = arith.extui %0 : i1 to i32
    %c0_i32_0 = arith.constant 0 : i32
    %2 = arith.cmpi ne, %1, %c0_i32_0 : i32
    scf.if %2 {
      %c0_38 = arith.constant 0 : index
      %c0_39 = arith.constant 0 : index
      %86 = vector.load %arg3[%c0_38, %c0_39] : memref<8x128xf32, #tpu.memory_space<vmem>>, vector<8x128xf32>
      %c0_40 = arith.constant 0 : index
      %c0_41 = arith.constant 0 : index
      %87 = vector.load %arg5[%c0_40, %c0_41] : memref<8x128xf32, #tpu.memory_space<vmem>>, vector<8x128xf32>
      tpu.vector_store %arg5[%c0_40, %c0_41], %86 {strides = array<i32>} : memref<8x128xf32, #tpu.memory_space<vmem>>, vector<8x128xf32>,
    } else {
    }
    %c0 = arith.constant 0 : index
    %c0_1 = arith.constant 0 : index
    %3 = vector.load %arg4[%c0, %c0_1] : memref<128x128xf32, #tpu.memory_space<vmem>>, vector<128x128xf32>
    %c0_2 = arith.constant 0 : index
    %c0_3 = arith.constant 0 : index
    %4 = vector.load %arg5[%c0_2, %c0_3] : memref<8x128xf32, #tpu.memory_space<vmem>>, vector<8x128xf32>
    %c0_i32_4 = arith.constant 0 : i32
    %cst = arith.constant dense<0.000000e+00> : vector<8x128xf32>
    %5 = tpu.matmul %4, %3, %cst {dimension_numbers = #tpu.dot_dimension_numbers<[1], [0], [0], [1], [0, 0, 1, 1], [], []>} : vector<8x128xf32>, vector<128x128xf32>, vector<8x128xf32> -> vector<8x128xf32>
    %6 = arith.index_cast %c0_i32_4 : i32 to index
    %c0_5 = arith.constant 0 : index
    %c0_6 = arith.constant 0 : index
    %7 = vector.load %arg2[%6, %c0_5, %c0_6] : memref<8x8x128xf32, #tpu.memory_space<vmem>>, vector<1x8x128xf32>
    %8 = vector.shape_cast %7 : vector<1x8x128xf32> to vector<8x128xf32>
    %9 = arith.addf %5, %8 : vector<8x128xf32>
    %10 = math.tanh %9 : vector<8x128xf32>
    %11 = arith.subf %10, %4 : vector<8x128xf32>
    %cst_7 = arith.constant 6.000000e-01 : f32
    %12 = vector.broadcast %cst_7 : f32 to vector<8x128xf32>
    %13 = arith.mulf %12, %11 : vector<8x128xf32>
    %14 = arith.addf %4, %13 : vector<8x128xf32>
    %c1_i32 = arith.constant 1 : i32
    %cst_8 = arith.constant dense<0.000000e+00> : vector<8x128xf32>
    %15 = tpu.matmul %14, %3, %cst_8 {dimension_numbers = #tpu.dot_dimension_numbers<[1], [0], [0], [1], [0, 0, 1, 1], [], []>} : vector<8x128xf32>, vector<128x128xf32>, vector<8x128xf32> -> vector<8x128xf32>
    %16 = arith.index_cast %c1_i32 : i32 to index
    %c0_9 = arith.constant 0 : index
    %c0_10 = arith.constant 0 : index
    %17 = vector.load %arg2[%16, %c0_9, %c0_10] : memref<8x8x128xf32, #tpu.memory_space<vmem>>, vector<1x8x128xf32>
    %18 = vector.shape_cast %17 : vector<1x8x128xf32> to vector<8x128xf32>
    %19 = arith.addf %15, %18 : vector<8x128xf32>
    %20 = math.tanh %19 : vector<8x128xf32>
    %21 = arith.subf %20, %14 : vector<8x128xf32>
    %cst_11 = arith.constant 6.000000e-01 : f32
    %22 = vector.broadcast %cst_11 : f32 to vector<8x128xf32>
    %23 = arith.mulf %22, %21 : vector<8x128xf32>
    %24 = arith.addf %14, %23 : vector<8x128xf32>
    %c2_i32 = arith.constant 2 : i32
    %cst_12 = arith.constant dense<0.000000e+00> : vector<8x128xf32>
    %25 = tpu.matmul %24, %3, %cst_12 {dimension_numbers = #tpu.dot_dimension_numbers<[1], [0], [0], [1], [0, 0, 1, 1], [], []>} : vector<8x128xf32>, vector<128x128xf32>, vector<8x128xf32> -> vector<8x128xf32>
    %26 = arith.index_cast %c2_i32 : i32 to index
    %c0_13 = arith.constant 0 : index
    %c0_14 = arith.constant 0 : index
    %27 = vector.load %arg2[%26, %c0_13, %c0_14] : memref<8x8x128xf32, #tpu.memory_space<vmem>>, vector<1x8x128xf32>
    %28 = vector.shape_cast %27 : vector<1x8x128xf32> to vector<8x128xf32>
    %29 = arith.addf %25, %28 : vector<8x128xf32>
    %30 = math.tanh %29 : vector<8x128xf32>
    %31 = arith.subf %30, %24 : vector<8x128xf32>
    %cst_15 = arith.constant 6.000000e-01 : f32
    %32 = vector.broadcast %cst_15 : f32 to vector<8x128xf32>
    %33 = arith.mulf %32, %31 : vector<8x128xf32>
    %34 = arith.addf %24, %33 : vector<8x128xf32>
    %c3_i32 = arith.constant 3 : i32
    %cst_16 = arith.constant dense<0.000000e+00> : vector<8x128xf32>
    %35 = tpu.matmul %34, %3, %cst_16 {dimension_numbers = #tpu.dot_dimension_numbers<[1], [0], [0], [1], [0, 0, 1, 1], [], []>} : vector<8x128xf32>, vector<128x128xf32>, vector<8x128xf32> -> vector<8x128xf32>
    %36 = arith.index_cast %c3_i32 : i32 to index
    %c0_17 = arith.constant 0 : index
    %c0_18 = arith.constant 0 : index
    %37 = vector.load %arg2[%36, %c0_17, %c0_18] : memref<8x8x128xf32, #tpu.memory_space<vmem>>, vector<1x8x128xf32>
    %38 = vector.shape_cast %37 : vector<1x8x128xf32> to vector<8x128xf32>
    %39 = arith.addf %35, %38 : vector<8x128xf32>
    %40 = math.tanh %39 : vector<8x128xf32>
    %41 = arith.subf %40, %34 : vector<8x128xf32>
    %cst_19 = arith.constant 6.000000e-01 : f32
    %42 = vector.broadcast %cst_19 : f32 to vector<8x128xf32>
    %43 = arith.mulf %42, %41 : vector<8x128xf32>
    %44 = arith.addf %34, %43 : vector<8x128xf32>
    %c4_i32 = arith.constant 4 : i32
    %cst_20 = arith.constant dense<0.000000e+00> : vector<8x128xf32>
    %45 = tpu.matmul %44, %3, %cst_20 {dimension_numbers = #tpu.dot_dimension_numbers<[1], [0], [0], [1], [0, 0, 1, 1], [], []>} : vector<8x128xf32>, vector<128x128xf32>, vector<8x128xf32> -> vector<8x128xf32>
    %46 = arith.index_cast %c4_i32 : i32 to index
    %c0_21 = arith.constant 0 : index
    %c0_22 = arith.constant 0 : index
    %47 = vector.load %arg2[%46, %c0_21, %c0_22] : memref<8x8x128xf32, #tpu.memory_space<vmem>>, vector<1x8x128xf32>
    %48 = vector.shape_cast %47 : vector<1x8x128xf32> to vector<8x128xf32>
    %49 = arith.addf %45, %48 : vector<8x128xf32>
    %50 = math.tanh %49 : vector<8x128xf32>
    %51 = arith.subf %50, %44 : vector<8x128xf32>
    %cst_23 = arith.constant 6.000000e-01 : f32
    %52 = vector.broadcast %cst_23 : f32 to vector<8x128xf32>
    %53 = arith.mulf %52, %51 : vector<8x128xf32>
    %54 = arith.addf %44, %53 : vector<8x128xf32>
    %c5_i32 = arith.constant 5 : i32
    %cst_24 = arith.constant dense<0.000000e+00> : vector<8x128xf32>
    %55 = tpu.matmul %54, %3, %cst_24 {dimension_numbers = #tpu.dot_dimension_numbers<[1], [0], [0], [1], [0, 0, 1, 1], [], []>} : vector<8x128xf32>, vector<128x128xf32>, vector<8x128xf32> -> vector<8x128xf32>
    %56 = arith.index_cast %c5_i32 : i32 to index
    %c0_25 = arith.constant 0 : index
    %c0_26 = arith.constant 0 : index
    %57 = vector.load %arg2[%56, %c0_25, %c0_26] : memref<8x8x128xf32, #tpu.memory_space<vmem>>, vector<1x8x128xf32>
    %58 = vector.shape_cast %57 : vector<1x8x128xf32> to vector<8x128xf32>
    %59 = arith.addf %55, %58 : vector<8x128xf32>
    %60 = math.tanh %59 : vector<8x128xf32>
    %61 = arith.subf %60, %54 : vector<8x128xf32>
    %cst_27 = arith.constant 6.000000e-01 : f32
    %62 = vector.broadcast %cst_27 : f32 to vector<8x128xf32>
    %63 = arith.mulf %62, %61 : vector<8x128xf32>
    %64 = arith.addf %54, %63 : vector<8x128xf32>
    %c6_i32 = arith.constant 6 : i32
    %cst_28 = arith.constant dense<0.000000e+00> : vector<8x128xf32>
    %65 = tpu.matmul %64, %3, %cst_28 {dimension_numbers = #tpu.dot_dimension_numbers<[1], [0], [0], [1], [0, 0, 1, 1], [], []>} : vector<8x128xf32>, vector<128x128xf32>, vector<8x128xf32> -> vector<8x128xf32>
    %66 = arith.index_cast %c6_i32 : i32 to index
    %c0_29 = arith.constant 0 : index
    %c0_30 = arith.constant 0 : index
    %67 = vector.load %arg2[%66, %c0_29, %c0_30] : memref<8x8x128xf32, #tpu.memory_space<vmem>>, vector<1x8x128xf32>
    %68 = vector.shape_cast %67 : vector<1x8x128xf32> to vector<8x128xf32>
    %69 = arith.addf %65, %68 : vector<8x128xf32>
    %70 = math.tanh %69 : vector<8x128xf32>
    %71 = arith.subf %70, %64 : vector<8x128xf32>
    %cst_31 = arith.constant 6.000000e-01 : f32
    %72 = vector.broadcast %cst_31 : f32 to vector<8x128xf32>
    %73 = arith.mulf %72, %71 : vector<8x128xf32>
    %74 = arith.addf %64, %73 : vector<8x128xf32>
    %c7_i32 = arith.constant 7 : i32
    %cst_32 = arith.constant dense<0.000000e+00> : vector<8x128xf32>
    %75 = tpu.matmul %74, %3, %cst_32 {dimension_numbers = #tpu.dot_dimension_numbers<[1], [0], [0], [1], [0, 0, 1, 1], [], []>} : vector<8x128xf32>, vector<128x128xf32>, vector<8x128xf32> -> vector<8x128xf32>
    %76 = arith.index_cast %c7_i32 : i32 to index
    %c0_33 = arith.constant 0 : index
    %c0_34 = arith.constant 0 : index
    %77 = vector.load %arg2[%76, %c0_33, %c0_34] : memref<8x8x128xf32, #tpu.memory_space<vmem>>, vector<1x8x128xf32>
    %78 = vector.shape_cast %77 : vector<1x8x128xf32> to vector<8x128xf32>
    %79 = arith.addf %75, %78 : vector<8x128xf32>
    %80 = math.tanh %79 : vector<8x128xf32>
    %81 = arith.subf %80, %74 : vector<8x128xf32>
    %cst_35 = arith.constant 6.000000e-01 : f32
    %82 = vector.broadcast %cst_35 : f32 to vector<8x128xf32>
    %83 = arith.mulf %82, %81 : vector<8x128xf32>
    %84 = arith.addf %74, %83 : vector<8x128xf32>
    %c8_i32 = arith.constant 8 : i32
    %c0_36 = arith.constant 0 : index
    %c0_37 = arith.constant 0 : index
    %85 = vector.load %arg5[%c0_36, %c0_37] : memref<8x128xf32, #tpu.memory_space<vmem>>, vector<8x128xf32>
    tpu.vector_store %arg5[%c0_36, %c0_37], %84 {strides = array<i32>} : memref<8x128xf32, #tpu.memory_space<vmem>>, vector<8x128xf32>,
    return
  }
  func.func @transform_0(%arg0: i32, %arg1: i32) -> (i32, i32, i32) {
    %c0_i32 = arith.constant 0 : i32
    %c0_i32_0 = arith.constant 0 : i32
    return %arg1, %arg0, %c0_i32 : i32, i32, i32
  }
  func.func @transform_1(%arg0: i32, %arg1: i32) -> (i32, i32) {
    %c0_i32 = arith.constant 0 : i32
    %c0_i32_0 = arith.constant 0 : i32
    return %arg0, %c0_i32 : i32, i32
  }
  func.func @transform_2(%arg0: i32, %arg1: i32) -> (i32, i32) {
    %c0_i32 = arith.constant 0 : i32
    %c0_i32_0 = arith.constant 0 : i32
    %c0_i32_1 = arith.constant 0 : i32
    return %c0_i32, %c0_i32_0 : i32, i32
  }
  func.func @transform_3(%arg0: i32, %arg1: i32) -> (i32, i32) {
    %c0_i32 = arith.constant 0 : i32
    %c0_i32_0 = arith.constant 0 : i32
    return %arg0, %c0_i32 : i32, i32
  }
}

module attributes {stable_mosaic.version = 11 : i64} {
  func.func @kernel(%arg0: i32, %arg1: i32, %arg2: memref<8x8x128xf32, #tpu.memory_space<vmem>>, %arg3: memref<8x128xf32, #tpu.memory_space<vmem>>, %arg4: memref<128x128xf32, #tpu.memory_space<vmem>>, %arg5: memref<8x128xf32, #tpu.memory_space<vmem>>) attributes {dimension_semantics = [#tpu.dimension_semantics<parallel>, #tpu.dimension_semantics<arbitrary>], iteration_bounds = array<i64: 1, 1>, scalar_prefetch = 0 : i64, scratch_operands = 0 : i64, tpu.core_type = #tpu.core_type<tc>, window_params = [{transform_indices = @transform_0, window_bounds = array<i64: 8, 8, 128>}, {transform_indices = @transform_1, window_bounds = array<i64: 8, 128>}, {pipeline_mode = #tpu.pipeline_mode<synchronous>, transform_indices = @transform_2, window_bounds = array<i64: 128, 128>}, {transform_indices = @transform_3, window_bounds = array<i64: 8, 128>}]} {
    %c0_i32 = arith.constant 0 : i32
    %0 = arith.cmpi eq, %arg1, %c0_i32 : i32
    %1 = arith.extui %0 : i1 to i32
    %c0_i32_0 = arith.constant 0 : i32
    %2 = arith.cmpi ne, %1, %c0_i32_0 : i32
    scf.if %2 {
      %c0_38 = arith.constant 0 : index
      %c0_39 = arith.constant 0 : index
      %86 = vector.load %arg3[%c0_38, %c0_39] : memref<8x128xf32, #tpu.memory_space<vmem>>, vector<8x128xf32>
      %c0_40 = arith.constant 0 : index
      %c0_41 = arith.constant 0 : index
      %87 = vector.load %arg5[%c0_40, %c0_41] : memref<8x128xf32, #tpu.memory_space<vmem>>, vector<8x128xf32>
      tpu.vector_store %arg5[%c0_40, %c0_41], %86 {strides = array<i32>} : memref<8x128xf32, #tpu.memory_space<vmem>>, vector<8x128xf32>,
    } else {
    }
    %c0 = arith.constant 0 : index
    %c0_1 = arith.constant 0 : index
    %3 = vector.load %arg4[%c0, %c0_1] : memref<128x128xf32, #tpu.memory_space<vmem>>, vector<128x128xf32>
    %c0_2 = arith.constant 0 : index
    %c0_3 = arith.constant 0 : index
    %4 = vector.load %arg5[%c0_2, %c0_3] : memref<8x128xf32, #tpu.memory_space<vmem>>, vector<8x128xf32>
    %c0_i32_4 = arith.constant 0 : i32
    %cst = arith.constant dense<0.000000e+00> : vector<8x128xf32>
    %5 = tpu.matmul %4, %3, %cst {dimension_numbers = #tpu.dot_dimension_numbers<[1], [0], [0], [1], [0, 0, 1, 1], [], []>} : vector<8x128xf32>, vector<128x128xf32>, vector<8x128xf32> -> vector<8x128xf32>
    %6 = arith.index_cast %c0_i32_4 : i32 to index
    %c0_5 = arith.constant 0 : index
    %c0_6 = arith.constant 0 : index
    %7 = vector.load %arg2[%6, %c0_5, %c0_6] : memref<8x8x128xf32, #tpu.memory_space<vmem>>, vector<1x8x128xf32>
    %8 = vector.shape_cast %7 : vector<1x8x128xf32> to vector<8x128xf32>
    %9 = arith.addf %5, %8 : vector<8x128xf32>
    %10 = math.tanh %9 : vector<8x128xf32>
    %11 = arith.subf %10, %4 : vector<8x128xf32>
    %cst_7 = arith.constant 6.000000e-01 : f32
    %12 = vector.broadcast %cst_7 : f32 to vector<8x128xf32>
    %13 = arith.mulf %12, %11 : vector<8x128xf32>
    %14 = arith.addf %4, %13 : vector<8x128xf32>
    %c1_i32 = arith.constant 1 : i32
    %cst_8 = arith.constant dense<0.000000e+00> : vector<8x128xf32>
    %15 = tpu.matmul %14, %3, %cst_8 {dimension_numbers = #tpu.dot_dimension_numbers<[1], [0], [0], [1], [0, 0, 1, 1], [], []>} : vector<8x128xf32>, vector<128x128xf32>, vector<8x128xf32> -> vector<8x128xf32>
    %16 = arith.index_cast %c1_i32 : i32 to index
    %c0_9 = arith.constant 0 : index
    %c0_10 = arith.constant 0 : index
    %17 = vector.load %arg2[%16, %c0_9, %c0_10] : memref<8x8x128xf32, #tpu.memory_space<vmem>>, vector<1x8x128xf32>
    %18 = vector.shape_cast %17 : vector<1x8x128xf32> to vector<8x128xf32>
    %19 = arith.addf %15, %18 : vector<8x128xf32>
    %20 = math.tanh %19 : vector<8x128xf32>
    %21 = arith.subf %20, %14 : vector<8x128xf32>
    %cst_11 = arith.constant 6.000000e-01 : f32
    %22 = vector.broadcast %cst_11 : f32 to vector<8x128xf32>
    %23 = arith.mulf %22, %21 : vector<8x128xf32>
    %24 = arith.addf %14, %23 : vector<8x128xf32>
    %c2_i32 = arith.constant 2 : i32
    %cst_12 = arith.constant dense<0.000000e+00> : vector<8x128xf32>
    %25 = tpu.matmul %24, %3, %cst_12 {dimension_numbers = #tpu.dot_dimension_numbers<[1], [0], [0], [1], [0, 0, 1, 1], [], []>} : vector<8x128xf32>, vector<128x128xf32>, vector<8x128xf32> -> vector<8x128xf32>
    %26 = arith.index_cast %c2_i32 : i32 to index
    %c0_13 = arith.constant 0 : index
    %c0_14 = arith.constant 0 : index
    %27 = vector.load %arg2[%26, %c0_13, %c0_14] : memref<8x8x128xf32, #tpu.memory_space<vmem>>, vector<1x8x128xf32>
    %28 = vector.shape_cast %27 : vector<1x8x128xf32> to vector<8x128xf32>
    %29 = arith.addf %25, %28 : vector<8x128xf32>
    %30 = math.tanh %29 : vector<8x128xf32>
    %31 = arith.subf %30, %24 : vector<8x128xf32>
    %cst_15 = arith.constant 6.000000e-01 : f32
    %32 = vector.broadcast %cst_15 : f32 to vector<8x128xf32>
    %33 = arith.mulf %32, %31 : vector<8x128xf32>
    %34 = arith.addf %24, %33 : vector<8x128xf32>
    %c3_i32 = arith.constant 3 : i32
    %cst_16 = arith.constant dense<0.000000e+00> : vector<8x128xf32>
    %35 = tpu.matmul %34, %3, %cst_16 {dimension_numbers = #tpu.dot_dimension_numbers<[1], [0], [0], [1], [0, 0, 1, 1], [], []>} : vector<8x128xf32>, vector<128x128xf32>, vector<8x128xf32> -> vector<8x128xf32>
    %36 = arith.index_cast %c3_i32 : i32 to index
    %c0_17 = arith.constant 0 : index
    %c0_18 = arith.constant 0 : index
    %37 = vector.load %arg2[%36, %c0_17, %c0_18] : memref<8x8x128xf32, #tpu.memory_space<vmem>>, vector<1x8x128xf32>
    %38 = vector.shape_cast %37 : vector<1x8x128xf32> to vector<8x128xf32>
    %39 = arith.addf %35, %38 : vector<8x128xf32>
    %40 = math.tanh %39 : vector<8x128xf32>
    %41 = arith.subf %40, %34 : vector<8x128xf32>
    %cst_19 = arith.constant 6.000000e-01 : f32
    %42 = vector.broadcast %cst_19 : f32 to vector<8x128xf32>
    %43 = arith.mulf %42, %41 : vector<8x128xf32>
    %44 = arith.addf %34, %43 : vector<8x128xf32>
    %c4_i32 = arith.constant 4 : i32
    %cst_20 = arith.constant dense<0.000000e+00> : vector<8x128xf32>
    %45 = tpu.matmul %44, %3, %cst_20 {dimension_numbers = #tpu.dot_dimension_numbers<[1], [0], [0], [1], [0, 0, 1, 1], [], []>} : vector<8x128xf32>, vector<128x128xf32>, vector<8x128xf32> -> vector<8x128xf32>
    %46 = arith.index_cast %c4_i32 : i32 to index
    %c0_21 = arith.constant 0 : index
    %c0_22 = arith.constant 0 : index
    %47 = vector.load %arg2[%46, %c0_21, %c0_22] : memref<8x8x128xf32, #tpu.memory_space<vmem>>, vector<1x8x128xf32>
    %48 = vector.shape_cast %47 : vector<1x8x128xf32> to vector<8x128xf32>
    %49 = arith.addf %45, %48 : vector<8x128xf32>
    %50 = math.tanh %49 : vector<8x128xf32>
    %51 = arith.subf %50, %44 : vector<8x128xf32>
    %cst_23 = arith.constant 6.000000e-01 : f32
    %52 = vector.broadcast %cst_23 : f32 to vector<8x128xf32>
    %53 = arith.mulf %52, %51 : vector<8x128xf32>
    %54 = arith.addf %44, %53 : vector<8x128xf32>
    %c5_i32 = arith.constant 5 : i32
    %cst_24 = arith.constant dense<0.000000e+00> : vector<8x128xf32>
    %55 = tpu.matmul %54, %3, %cst_24 {dimension_numbers = #tpu.dot_dimension_numbers<[1], [0], [0], [1], [0, 0, 1, 1], [], []>} : vector<8x128xf32>, vector<128x128xf32>, vector<8x128xf32> -> vector<8x128xf32>
    %56 = arith.index_cast %c5_i32 : i32 to index
    %c0_25 = arith.constant 0 : index
    %c0_26 = arith.constant 0 : index
    %57 = vector.load %arg2[%56, %c0_25, %c0_26] : memref<8x8x128xf32, #tpu.memory_space<vmem>>, vector<1x8x128xf32>
    %58 = vector.shape_cast %57 : vector<1x8x128xf32> to vector<8x128xf32>
    %59 = arith.addf %55, %58 : vector<8x128xf32>
    %60 = math.tanh %59 : vector<8x128xf32>
    %61 = arith.subf %60, %54 : vector<8x128xf32>
    %cst_27 = arith.constant 6.000000e-01 : f32
    %62 = vector.broadcast %cst_27 : f32 to vector<8x128xf32>
    %63 = arith.mulf %62, %61 : vector<8x128xf32>
    %64 = arith.addf %54, %63 : vector<8x128xf32>
    %c6_i32 = arith.constant 6 : i32
    %cst_28 = arith.constant dense<0.000000e+00> : vector<8x128xf32>
    %65 = tpu.matmul %64, %3, %cst_28 {dimension_numbers = #tpu.dot_dimension_numbers<[1], [0], [0], [1], [0, 0, 1, 1], [], []>} : vector<8x128xf32>, vector<128x128xf32>, vector<8x128xf32> -> vector<8x128xf32>
    %66 = arith.index_cast %c6_i32 : i32 to index
    %c0_29 = arith.constant 0 : index
    %c0_30 = arith.constant 0 : index
    %67 = vector.load %arg2[%66, %c0_29, %c0_30] : memref<8x8x128xf32, #tpu.memory_space<vmem>>, vector<1x8x128xf32>
    %68 = vector.shape_cast %67 : vector<1x8x128xf32> to vector<8x128xf32>
    %69 = arith.addf %65, %68 : vector<8x128xf32>
    %70 = math.tanh %69 : vector<8x128xf32>
    %71 = arith.subf %70, %64 : vector<8x128xf32>
    %cst_31 = arith.constant 6.000000e-01 : f32
    %72 = vector.broadcast %cst_31 : f32 to vector<8x128xf32>
    %73 = arith.mulf %72, %71 : vector<8x128xf32>
    %74 = arith.addf %64, %73 : vector<8x128xf32>
    %c7_i32 = arith.constant 7 : i32
    %cst_32 = arith.constant dense<0.000000e+00> : vector<8x128xf32>
    %75 = tpu.matmul %74, %3, %cst_32 {dimension_numbers = #tpu.dot_dimension_numbers<[1], [0], [0], [1], [0, 0, 1, 1], [], []>} : vector<8x128xf32>, vector<128x128xf32>, vector<8x128xf32> -> vector<8x128xf32>
    %76 = arith.index_cast %c7_i32 : i32 to index
    %c0_33 = arith.constant 0 : index
    %c0_34 = arith.constant 0 : index
    %77 = vector.load %arg2[%76, %c0_33, %c0_34] : memref<8x8x128xf32, #tpu.memory_space<vmem>>, vector<1x8x128xf32>
    %78 = vector.shape_cast %77 : vector<1x8x128xf32> to vector<8x128xf32>
    %79 = arith.addf %75, %78 : vector<8x128xf32>
    %80 = math.tanh %79 : vector<8x128xf32>
    %81 = arith.subf %80, %74 : vector<8x128xf32>
    %cst_35 = arith.constant 6.000000e-01 : f32
    %82 = vector.broadcast %cst_35 : f32 to vector<8x128xf32>
    %83 = arith.mulf %82, %81 : vector<8x128xf32>
    %84 = arith.addf %74, %83 : vector<8x128xf32>
    %c8_i32 = arith.constant 8 : i32
    %c0_36 = arith.constant 0 : index
    %c0_37 = arith.constant 0 : index
    %85 = vector.load %arg5[%c0_36, %c0_37] : memref<8x128xf32, #tpu.memory_space<vmem>>, vector<8x128xf32>
    tpu.vector_store %arg5[%c0_36, %c0_37], %84 {strides = array<i32>} : memref<8x128xf32, #tpu.memory_space<vmem>>, vector<8x128xf32>,
    return
  }
  func.func @transform_0(%arg0: i32, %arg1: i32) -> (i32, i32, i32) {
    %c0_i32 = arith.constant 0 : i32
    %c0_i32_0 = arith.constant 0 : i32
    return %arg1, %arg0, %c0_i32 : i32, i32, i32
  }
  func.func @transform_1(%arg0: i32, %arg1: i32) -> (i32, i32) {
    %c0_i32 = arith.constant 0 : i32
    %c0_i32_0 = arith.constant 0 : i32
    return %arg0, %c0_i32 : i32, i32
  }
  func.func @transform_2(%arg0: i32, %arg1: i32) -> (i32, i32) {
    %c0_i32 = arith.constant 0 : i32
    %c0_i32_0 = arith.constant 0 : i32
    %c0_i32_1 = arith.constant 0 : i32
    return %c0_i32, %c0_i32_0 : i32, i32
  }
  func.func @transform_3(%arg0: i32, %arg1: i32) -> (i32, i32) {
    %c0_i32 = arith.constant 0 : i32
    %c0_i32_0 = arith.constant 0 : i32
    return %arg0, %c0_i32 : i32, i32
  }
}

</mosaic_0001>

<bundles_post_ra>
// kernel: tpu_custom_call.1
= control target key start
LH: loop header
LB: loop body
LE: loop exit
PB: predicated region body
PF: predicated region fallthrough
CT: control target
= control target key end

     0   :  { %8 = vsyncpa [#allocation3], 0  ;;  %s1672_s0 = inlined_call_operand.hbm [shape: f32[8,8,128], index: 0, kind: input, shape index: {}]   ;;  %s1673_s1 = inlined_call_operand.hbm [shape: f32[8,128], index: 1, kind: input, shape index: {}]   ;;  %s1674_s2 = inlined_call_operand.hbm [shape: f32[128,128], index: 2, kind: input, shape index: {}]   ;;  %s1675_s3 = inlined_call_operand.hbm [shape: f32[8,128], index: 3, kind: output, shape index: {}]  }
   0x1   :  { %9 = vsyncpa [#allocation6], 0 }
   0x2   :  { %10 = vsyncpa [#allocation4], 0  ;;  %s1428_s12 = smov [#allocation5]   ;;  %s1429_s14 = smov [#allocation2]  }
   0x3   :  { %s29_s13 = sshll.u32 %s1428_s12, 4  ;;  %s16_s15 = sshll.u32 %s1429_s14, 4  ;;  %s30_s13 = int_to_ptr.vmem [resolvable:$true] %s29_s13  ;;  %s1457_s15 = int_to_ptr.vmem [resolvable:$true] %s16_s15 }
   0x4   :  { %s1334_s18 = scalar_lea.hbm %s1673_s1, 128 }
   0x5   :  { %p1335_p0 = scmp.ne.s32.totalorder %s1673_s1, %s1334_s18  ;;  %p1338_p1 = scmp.lt.u32.totalorder %s1334_s18, %s1673_s1 }
   0x7   :  { %p1340_p2 = pnand %p1338_p1, %p1335_p0 }
   0x9   :  { %1343 = shalt.err (!%p1340_p2)
}
   0xa   :  { %s1344_s23 = scalar_lea.vmem %s30_s13, 128  ;;  %p1349_p4 = scmp.lt.s32.totalorder %s30_s13, %s30_s13 }
   0xb   :  { %p1345_p3 = scmp.ne.s32.totalorder %s30_s13, %s1344_s23  ;;  %p1350_p5 = scmp.lt.s32.totalorder %s1344_s23, %s1344_s23 }
   0xd   :  { %p1351_p6 = por %p1350_p5, %p1349_p4 }
   0xf   :  { %p1352_p7 = pnand %p1351_p6, %p1345_p3 }
  0x11   :  { %1355 = shalt.err (!%p1352_p7)
}
  0x12   :  { %32 = dma.hbm_to_vmem [thread:$0]  %s1673_s1, 128, %s30_s13, [#allocation6]  }
  0x13   :  { %s1356_s28 = scalar_lea.hbm %s1672_s0, 1024 }
  0x14   :  { %p1357_p8 = scmp.ne.s32.totalorder %s1672_s0, %s1356_s28  ;;  %p1360_p9 = scmp.lt.u32.totalorder %s1356_s28, %s1672_s0 }
  0x16   :  { %p1362_p10 = pnand %p1360_p9, %p1357_p8 }
  0x18   :  { %1365 = shalt.err (!%p1362_p10)
}
  0x19   :  { %s1366_s6 = scalar_lea.vmem %s1457_s15, 1024  ;;  %p1371_p12 = scmp.lt.s32.totalorder %s1457_s15, %s1457_s15 }
  0x1a   :  { %p1367_p11 = scmp.ne.s32.totalorder %s1457_s15, %s1366_s6  ;;  %p1372_p13 = scmp.lt.s32.totalorder %s1366_s6, %s1366_s6 }
  0x1c   :  { %p1373_p0 = por %p1372_p13, %p1371_p12 }
  0x1e   :  { %p1374_p1 = pnand %p1373_p0, %p1367_p11 }
  0x20   :  { %1377 = shalt.err (!%p1374_p1)
}
  0x21   :  { %s1430_s1 = smov 128   ;;  %s1431_s7 = smov 8  }
  0x22   :  { %22 = dma.hbm_to_vmem [thread:$0]  %s1672_s0, 1024, %s1457_s15, [#allocation3], %s1430_s1, %s1430_s1, %s1431_s7  }
  0x23   :  { %s1432_s10 = smov [#allocation7]   ;;  %s1378_s14 = scalar_lea.hbm %s1674_s2, 2048 }
  0x24   :  { %s38_s11 = sshll.u32 %s1432_s10, 4  ;;  %p1379_p2 = scmp.ne.s32.totalorder %s1674_s2, %s1378_s14  ;;  %s39_s11 = int_to_ptr.vmem [resolvable:$true] %s38_s11 }
  0x25   :  { %p1382_p3 = scmp.lt.u32.totalorder %s1378_s14, %s1674_s2 }
  0x27   :  { %p1384_p4 = pnand %p1382_p3, %p1379_p2 }
  0x29   :  { %1387 = shalt.err (!%p1384_p4)
}
  0x2a   :  { %s1388_s20 = scalar_lea.vmem %s39_s11, 2048  ;;  %p1393_p6 = scmp.lt.s32.totalorder %s39_s11, %s39_s11 }
  0x2b   :  { %p1389_p5 = scmp.ne.s32.totalorder %s39_s11, %s1388_s20  ;;  %p1394_p7 = scmp.lt.s32.totalorder %s1388_s20, %s1388_s20 }
  0x2d   :  { %p1395_p8 = por %p1394_p7, %p1393_p6 }
  0x2f   :  { %p1396_p9 = pnand %p1395_p8, %p1389_p5 }
  0x31   :  { %1399 = shalt.err (!%p1396_p9)
}
  0x32   :  { %44 = dma.hbm_to_vmem [thread:$0]  %s1674_s2, 2048, %s39_s11, [#allocation6], %s1430_s1, %s1430_s1, %s1431_s7  }
  0x33   :  { %1422 = dma.done.wait [#allocation3], 1024  }
  0x34   :  { %1423 = vsyncadd [#allocation3], 4294966272 }
  0x35   :  { %1424 = dma.done.wait [#allocation6], 2176  }
  0x36   :  { %1425 = vsyncadd [#allocation6], 4294965120  ;;  %v1433_v0 = vmov 0.0|0.0   ;;  %vm1434_vm0 = vmmov 0   ;;  %v1435_v1 = vmov 0.0   ;;  %v60_v2 = vld [vmem:[#allocation7] sm:$0xff] }
  0x37   :  { %1117 = vmatprep.subr.bf16.mxu0 %v1433_v0  ;;  %869 = vmatprep.mubr.msk.f32.mxu0 %vm1434_vm0, %v1435_v1  ;;  %v61_v3 = vld [vmem:[#allocation7 + $0x8] sm:$0xff]  ;;  %v62_v4 = vld [vmem:[#allocation7 + $0x10] sm:$0xff]  ;;  %v63_v6 = vld [vmem:[#allocation7 + $0x18] sm:$0xff]  ;;  %s1436_s2 = smov [#allocation8]  }
  0x38   :  { %1141 = vmatprep.subr.bf16.mxu1 %v1433_v0  ;;  %904 = vmatprep.mubr.msk.f32.mxu1 %vm1434_vm0, %v1435_v1  ;;  %v1506_v5 = vpack.c.bf16 %v61_v3, %v60_v2  ;;  %v1509_v7 = vpack.c.bf16 %v63_v6, %v62_v4  ;;  %v64_v8 = vld [vmem:[#allocation7 + $0x20] sm:$0xff]  ;;  %v65_v9 = vld [vmem:[#allocation7 + $0x28] sm:$0xff]  ;;  %v66_v11 = vld [vmem:[#allocation7 + $0x30] sm:$0xff]  ;;  %s691_s21 = sshll.u32 %s1436_s2, 4  ;;  %s692_s21 = int_to_ptr.vmem [resolvable:$true] %s691_s21 }
  0x39   :  { %v1515_v10 = vpack.c.bf16 %v65_v9, %v64_v8  ;;  %v67_v12 = vld [vmem:[#allocation7 + $0x38] sm:$0xff]  ;;  %v68_v14 = vld [vmem:[#allocation7 + $0x40] sm:$0xff]  ;;  %v69_v15 = vld [vmem:[#allocation7 + $0x48] sm:$0xff]  ;;  %s1400_s22 = scalar_lea.vmem %s692_s21, 128  ;;  %p1405_p11 = scmp.lt.s32.totalorder %s692_s21, %s692_s21 }
  0x3a   :  { %1119 = vmatpush3.bf16.msra.mxu0 %v1506_v5  ;;  %1143 = vmatpush3.bf16.msra.mxu1 %v1506_v5  ;;  %v1521_v13 = vpack.c.bf16 %v67_v12, %v66_v11  ;;  %v1527_v16 = vpack.c.bf16 %v69_v15, %v68_v14  ;;  %v70_v17 = vld [vmem:[#allocation7 + $0x50] sm:$0xff]  ;;  %v71_v18 = vld [vmem:[#allocation7 + $0x58] sm:$0xff]  ;;  %v72_v20 = vld [vmem:[#allocation7 + $0x60] sm:$0xff]  ;;  %p1401_p10 = scmp.ne.s32.totalorder %s692_s21, %s1400_s22  ;;  %p1406_p12 = scmp.lt.s32.totalorder %s1400_s22, %s1400_s22 }
  0x3b   :  { %1120 = vmatprep.subr.bf16.mxu0 %v1433_v0  ;;  %1144 = vmatprep.subr.bf16.mxu1 %v1433_v0  ;;  %v1533_v19 = vpack.c.bf16 %v71_v18, %v70_v17  ;;  %v73_v21 = vld [vmem:[#allocation7 + $0x68] sm:$0xff]  ;;  %v74_v23 = vld [vmem:[#allocation7 + $0x70] sm:$0xff]  ;;  %v75_v24 = vld [vmem:[#allocation7 + $0x78] sm:$0xff] }
  0x3c   :  { %v1539_v22 = vpack.c.bf16 %v73_v21, %v72_v20  ;;  %v1545_v25 = vpack.c.bf16 %v75_v24, %v74_v23  ;;  %v58_v26 = vld [vmem:[#allocation5] sm:$0xff]  ;;  %v153_v35 = vld [vmem:[#allocation2 + $0x8] sm:$0xff]  ;;  %v229_v43 = vld [vmem:[#allocation2 + $0x10] sm:$0xff]  ;;  %p1407_p13 = por %p1406_p12, %p1405_p11 }
  0x3d   :  { %v77_v27 = vld [vmem:[#allocation2] sm:$0xff]  ;;  %v305_v51 = vld [vmem:[#allocation2 + $0x18] sm:$0xff]  ;;  %v533_v12 = vld [vmem:[#allocation2 + $0x30] sm:$0xff] }
  0x3e   :  { %1122 = vmatpush3.bf16.msra.mxu0 %v1509_v7  ;;  %1146 = vmatpush3.bf16.msra.mxu1 %v1509_v7  ;;  %v381_v59 = vld [vmem:[#allocation2 + $0x20] sm:$0xff]  ;;  %p1408_p0 = pnand %p1407_p13, %p1401_p10 }
  0x3f   :  { %1123 = vmatprep.subr.bf16.mxu0 %v1433_v0  ;;  %1147 = vmatprep.subr.bf16.mxu1 %v1433_v0 }
  0x42   :  { %1125 = vmatpush3.bf16.msra.mxu0 %v1515_v10  ;;  %1149 = vmatpush3.bf16.msra.mxu1 %v1515_v10 }
  0x43   :  { %1126 = vmatprep.subr.bf16.mxu0 %v1433_v0  ;;  %1150 = vmatprep.subr.bf16.mxu1 %v1433_v0 }
  0x46   :  { %1128 = vmatpush3.bf16.msra.mxu0 %v1521_v13  ;;  %1152 = vmatpush3.bf16.msra.mxu1 %v1521_v13 }
  0x47   :  { %1129 = vmatprep.subr.bf16.mxu0 %v1433_v0  ;;  %1153 = vmatprep.subr.bf16.mxu1 %v1433_v0 }
  0x4a   :  { %1131 = vmatpush3.bf16.msra.mxu0 %v1527_v16  ;;  %1155 = vmatpush3.bf16.msra.mxu1 %v1527_v16 }
  0x4b   :  { %1132 = vmatprep.subr.bf16.mxu0 %v1433_v0  ;;  %1156 = vmatprep.subr.bf16.mxu1 %v1433_v0 }
  0x4e   :  { %1134 = vmatpush3.bf16.msra.mxu0 %v1533_v19  ;;  %1158 = vmatpush3.bf16.msra.mxu1 %v1533_v19 }
  0x4f   :  { %1135 = vmatprep.subr.bf16.mxu0 %v1433_v0  ;;  %1159 = vmatprep.subr.bf16.mxu1 %v1433_v0 }
  0x52   :  { %1137 = vmatpush3.bf16.msra.mxu0 %v1539_v22  ;;  %1161 = vmatpush3.bf16.msra.mxu1 %v1539_v22 }
  0x53   :  { %1138 = vmatprep.subr.bf16.mxu0 %v1433_v0  ;;  %1162 = vmatprep.subr.bf16.mxu1 %v1433_v0 }
  0x56   :  { %1140 = vmatpush3.bf16.msra.mxu0 %v1545_v25  ;;  %1164 = vmatpush3.bf16.msra.mxu1 %v1545_v25 }
  0x57   :  { %1165 = vmatprep.subr.bf16.mxu0 %v1433_v0  ;;  %1189 = vmatprep.subr.bf16.mxu1 %v1433_v0 }
  0x59   :  { %870 = vmatmul.mubr.f32.vlgmr.msra.gmra.mrb[0].mxu0 %v58_v26 }
  0x5a   :  { %1167 = vmatpush3.bf16.msra.mxu0 %v1506_v5  ;;  %939 = vmatprep.mubr.msk.f32.mxu0 %vm1434_vm0, %v1435_v1 }
  0x5b   :  { %1168 = vmatprep.subr.bf16.mxu0 %v1433_v0 }
  0x5e   :  { %1170 = vmatpush3.bf16.msra.mxu0 %v1509_v7 }
  0x5f   :  { %1171 = vmatprep.subr.bf16.mxu0 %v1433_v0 }
  0x62   :  { %1173 = vmatpush3.bf16.msra.mxu0 %v1515_v10 }
  0x63   :  { %1174 = vmatprep.subr.bf16.mxu0 %v1433_v0 }
  0x66   :  { %1176 = vmatpush3.bf16.msra.mxu0 %v1521_v13 }
  0x67   :  { %1177 = vmatprep.subr.bf16.mxu0 %v1433_v0 }
  0x6a   :  { %1179 = vmatpush3.bf16.msra.mxu0 %v1527_v16 }
  0x6b   :  { %1180 = vmatprep.subr.bf16.mxu0 %v1433_v0 }
  0x6e   :  { %1182 = vmatpush3.bf16.msra.mxu0 %v1533_v19 }
  0x6f   :  { %1183 = vmatprep.subr.bf16.mxu0 %v1433_v0 }
  0x72   :  { %1185 = vmatpush3.bf16.msra.mxu0 %v1539_v22 }
  0x73   :  { %1186 = vmatprep.subr.bf16.mxu0 %v1433_v0 }
  0x76   :  { %1188 = vmatpush3.bf16.msra.mxu0 %v1545_v25 }
  0x77   :  { %1213 = vmatprep.subr.bf16.mxu0 %v1433_v0 }
 0x12c   :  { %v144_v28 = vpop.f32.mrb[0].mxu0 }
 0x12d   :  { %v145_v29 = vadd.f32 %v144_v28, %v77_v27  ;;  %v871_v30 = vpop.f32.mrb[1].mxu0 }
 0x12f   :  { %1318 = vtanh.f32 %v145_v29 }
 0x139   :  { %v1319_v31 = vpop.eup %1318 }
 0x13a   :  { %v149_v32 = vsub.f32 %v1319_v31, %v58_v26 }
 0x13c   :  { %v150_v33 = vmul.f32 0.6, %v149_v32 }
 0x13e   :  { %v151_v34 = vadd.f32 %v150_v33, %v58_v26 }
 0x140   :  { %905 = vmatmul.mubr.f32.vlgmr.msra.gmra.mrb[0].mxu1 %v151_v34 }
 0x141   :  { %1191 = vmatpush3.bf16.msra.mxu1 %v1506_v5  ;;  %974 = vmatprep.mubr.msk.f32.mxu1 %vm1434_vm0, %v1435_v1 }
 0x142   :  { %1192 = vmatprep.subr.bf16.mxu1 %v1433_v0 }
 0x145   :  { %1194 = vmatpush3.bf16.msra.mxu1 %v1509_v7 }
 0x146   :  { %1195 = vmatprep.subr.bf16.mxu1 %v1433_v0 }
 0x149   :  { %1197 = vmatpush3.bf16.msra.mxu1 %v1515_v10 }
 0x14a   :  { %1198 = vmatprep.subr.bf16.mxu1 %v1433_v0 }
 0x14d   :  { %1200 = vmatpush3.bf16.msra.mxu1 %v1521_v13 }
 0x14e   :  { %1201 = vmatprep.subr.bf16.mxu1 %v1433_v0 }
 0x151   :  { %1203 = vmatpush3.bf16.msra.mxu1 %v1527_v16 }
 0x152   :  { %1204 = vmatprep.subr.bf16.mxu1 %v1433_v0 }
 0x155   :  { %1206 = vmatpush3.bf16.msra.mxu1 %v1533_v19 }
 0x156   :  { %1207 = vmatprep.subr.bf16.mxu1 %v1433_v0 }
 0x159   :  { %1209 = vmatpush3.bf16.msra.mxu1 %v1539_v22 }
 0x15a   :  { %1210 = vmatprep.subr.bf16.mxu1 %v1433_v0 }
 0x15d   :  { %1212 = vmatpush3.bf16.msra.mxu1 %v1545_v25 }
 0x15e   :  { %1237 = vmatprep.subr.bf16.mxu1 %v1433_v0 }
 0x213   :  { %v220_v36 = vpop.f32.mrb[0].mxu1 }
 0x214   :  { %v221_v37 = vadd.f32 %v220_v36, %v153_v35  ;;  %v906_v38 = vpop.f32.mrb[1].mxu1 }
 0x216   :  { %1320 = vtanh.f32 %v221_v37 }
 0x220   :  { %v1321_v39 = vpop.eup %1320 }
 0x221   :  { %v225_v40 = vsub.f32 %v1321_v39, %v151_v34 }
 0x223   :  { %v226_v41 = vmul.f32 0.6, %v225_v40 }
 0x225   :  { %v227_v42 = vadd.f32 %v226_v41, %v151_v34 }
 0x227   :  { %940 = vmatmul.mubr.f32.vlgmr.msra.gmra.mrb[2].mxu0 %v227_v42 }
 0x228   :  { %1215 = vmatpush3.bf16.msra.mxu0 %v1506_v5  ;;  %1009 = vmatprep.mubr.msk.f32.mxu0 %vm1434_vm0, %v1435_v1 }
 0x229   :  { %1216 = vmatprep.subr.bf16.mxu0 %v1433_v0 }
 0x22c   :  { %1218 = vmatpush3.bf16.msra.mxu0 %v1509_v7 }
 0x22d   :  { %1219 = vmatprep.subr.bf16.mxu0 %v1433_v0 }
 0x230   :  { %1221 = vmatpush3.bf16.msra.mxu0 %v1515_v10 }
 0x231   :  { %1222 = vmatprep.subr.bf16.mxu0 %v1433_v0 }
 0x234   :  { %1224 = vmatpush3.bf16.msra.mxu0 %v1521_v13 }
 0x235   :  { %1225 = vmatprep.subr.bf16.mxu0 %v1433_v0 }
 0x238   :  { %1227 = vmatpush3.bf16.msra.mxu0 %v1527_v16 }
 0x239   :  { %1228 = vmatprep.subr.bf16.mxu0 %v1433_v0 }
 0x23c   :  { %1230 = vmatpush3.bf16.msra.mxu0 %v1533_v19 }
 0x23d   :  { %1231 = vmatprep.subr.bf16.mxu0 %v1433_v0 }
 0x240   :  { %1233 = vmatpush3.bf16.msra.mxu0 %v1539_v22 }
 0x241   :  { %1234 = vmatprep.subr.bf16.mxu0 %v1433_v0 }
 0x244   :  { %1236 = vmatpush3.bf16.msra.mxu0 %v1545_v25 }
 0x245   :  { %1261 = vmatprep.subr.bf16.mxu0 %v1433_v0 }
 0x2fa   :  { %v296_v44 = vpop.f32.mrb[2].mxu0 }
 0x2fb   :  { %v297_v45 = vadd.f32 %v296_v44, %v229_v43  ;;  %v941_v46 = vpop.f32.mrb[3].mxu0 }
 0x2fd   :  { %1322 = vtanh.f32 %v297_v45 }
 0x307   :  { %v1323_v47 = vpop.eup %1322 }
 0x308   :  { %v301_v48 = vsub.f32 %v1323_v47, %v227_v42 }
 0x30a   :  { %v302_v49 = vmul.f32 0.6, %v301_v48 }
 0x30c   :  { %v303_v50 = vadd.f32 %v302_v49, %v227_v42 }
 0x30e   :  { %975 = vmatmul.mubr.f32.vlgmr.msra.gmra.mrb[2].mxu1 %v303_v50 }
 0x30f   :  { %1239 = vmatpush3.bf16.msra.mxu1 %v1506_v5  ;;  %1044 = vmatprep.mubr.msk.f32.mxu1 %vm1434_vm0, %v1435_v1 }
 0x310   :  { %1240 = vmatprep.subr.bf16.mxu1 %v1433_v0 }
 0x313   :  { %1242 = vmatpush3.bf16.msra.mxu1 %v1509_v7 }
 0x314   :  { %1243 = vmatprep.subr.bf16.mxu1 %v1433_v0 }
 0x317   :  { %1245 = vmatpush3.bf16.msra.mxu1 %v1515_v10 }
 0x318   :  { %1246 = vmatprep.subr.bf16.mxu1 %v1433_v0 }
 0x31b   :  { %1248 = vmatpush3.bf16.msra.mxu1 %v1521_v13 }
 0x31c   :  { %1249 = vmatprep.subr.bf16.mxu1 %v1433_v0 }
 0x31f   :  { %1251 = vmatpush3.bf16.msra.mxu1 %v1527_v16 }
 0x320   :  { %1252 = vmatprep.subr.bf16.mxu1 %v1433_v0 }
 0x323   :  { %1254 = vmatpush3.bf16.msra.mxu1 %v1533_v19 }
 0x324   :  { %1255 = vmatprep.subr.bf16.mxu1 %v1433_v0 }
 0x327   :  { %1257 = vmatpush3.bf16.msra.mxu1 %v1539_v22 }
 0x328   :  { %1258 = vmatprep.subr.bf16.mxu1 %v1433_v0 }
 0x32b   :  { %1260 = vmatpush3.bf16.msra.mxu1 %v1545_v25 }
 0x32c   :  { %1285 = vmatprep.subr.bf16.mxu1 %v1433_v0 }
 0x3e1   :  { %v372_v52 = vpop.f32.mrb[2].mxu1 }
 0x3e2   :  { %v373_v53 = vadd.f32 %v372_v52, %v305_v51  ;;  %v976_v54 = vpop.f32.mrb[3].mxu1 }
 0x3e4   :  { %1324 = vtanh.f32 %v373_v53 }
 0x3ee   :  { %v1325_v55 = vpop.eup %1324 }
 0x3ef   :  { %v377_v56 = vsub.f32 %v1325_v55, %v303_v50 }
 0x3f1   :  { %v378_v57 = vmul.f32 0.6, %v377_v56 }
 0x3f3   :  { %v379_v58 = vadd.f32 %v378_v57, %v303_v50 }
 0x3f5   :  { %1010 = vmatmul.mubr.f32.vlgmr.msra.gmra.mrb[4].mxu0 %v379_v58 }
 0x3f6   :  { %1263 = vmatpush3.bf16.msra.mxu0 %v1506_v5  ;;  %1079 = vmatprep.mubr.msk.f32.mxu0 %vm1434_vm0, %v1435_v1 }
 0x3f7   :  { %1264 = vmatprep.subr.bf16.mxu0 %v1433_v0 }
 0x3fa   :  { %1266 = vmatpush3.bf16.msra.mxu0 %v1509_v7 }
 0x3fb   :  { %1267 = vmatprep.subr.bf16.mxu0 %v1433_v0 }
 0x3fe   :  { %1269 = vmatpush3.bf16.msra.mxu0 %v1515_v10 }
 0x3ff   :  { %1270 = vmatprep.subr.bf16.mxu0 %v1433_v0 }
 0x402   :  { %1272 = vmatpush3.bf16.msra.mxu0 %v1521_v13 }
 0x403   :  { %1273 = vmatprep.subr.bf16.mxu0 %v1433_v0 }
 0x406   :  { %1275 = vmatpush3.bf16.msra.mxu0 %v1527_v16 }
 0x407   :  { %1276 = vmatprep.subr.bf16.mxu0 %v1433_v0 }
 0x40a   :  { %1278 = vmatpush3.bf16.msra.mxu0 %v1533_v19 }
 0x40b   :  { %1279 = vmatprep.subr.bf16.mxu0 %v1433_v0 }
 0x40e   :  { %1281 = vmatpush3.bf16.msra.mxu0 %v1539_v22 }
 0x40f   :  { %1282 = vmatprep.subr.bf16.mxu0 %v1433_v0 }
 0x412   :  { %1284 = vmatpush3.bf16.msra.mxu0 %v1545_v25 }
 0x4c8   :  { %v448_v60 = vpop.f32.mrb[4].mxu0 }
 0x4c9   :  { %v449_v61 = vadd.f32 %v448_v60, %v381_v59  ;;  %v1011_v62 = vpop.f32.mrb[5].mxu0 }
 0x4cb   :  { %1326 = vtanh.f32 %v449_v61 }
 0x4d5   :  { %v1327_v63 = vpop.eup %1326 }
 0x4d6   :  { %v453_v2 = vsub.f32 %v1327_v63, %v379_v58 }
 0x4d8   :  { %v454_v3 = vmul.f32 0.6, %v453_v2 }
 0x4da   :  { %v455_v4 = vadd.f32 %v454_v3, %v379_v58 }
 0x4dc   :  { %1045 = vmatmul.mubr.f32.vlgmr.msra.gmra.mrb[4].mxu1 %v455_v4 }
 0x4dd   :  { %1287 = vmatpush3.bf16.msra.mxu1 %v1506_v5  ;;  %1114 = vmatprep.mubr.msk.f32.mxu1 %vm1434_vm0, %v1435_v1  ;;  %v457_v1 = vld [vmem:[#allocation2 + $0x28] sm:$0xff] }
 0x4de   :  { %1288 = vmatprep.subr.bf16.mxu1 %v1433_v0 }
 0x4e1   :  { %1290 = vmatpush3.bf16.msra.mxu1 %v1509_v7 }
 0x4e2   :  { %1291 = vmatprep.subr.bf16.mxu1 %v1433_v0 }
 0x4e5   :  { %1293 = vmatpush3.bf16.msra.mxu1 %v1515_v10 }
 0x4e6   :  { %1294 = vmatprep.subr.bf16.mxu1 %v1433_v0 }
 0x4e9   :  { %1296 = vmatpush3.bf16.msra.mxu1 %v1521_v13 }
 0x4ea   :  { %1297 = vmatprep.subr.bf16.mxu1 %v1433_v0 }
 0x4ed   :  { %1299 = vmatpush3.bf16.msra.mxu1 %v1527_v16 }
 0x4ee   :  { %1300 = vmatprep.subr.bf16.mxu1 %v1433_v0 }
 0x4f1   :  { %1302 = vmatpush3.bf16.msra.mxu1 %v1533_v19  ;;  %v609_v19 = vld [vmem:[#allocation2 + $0x38] sm:$0xff] }
 0x4f2   :  { %1303 = vmatprep.subr.bf16.mxu1 %v1433_v0 }
 0x4f5   :  { %1305 = vmatpush3.bf16.msra.mxu1 %v1539_v22 }
 0x4f6   :  { %1306 = vmatprep.subr.bf16.mxu1 %v1433_v0 }
 0x4f9   :  { %1308 = vmatpush3.bf16.msra.mxu1 %v1545_v25 }
 0x5af   :  { %v524_v5 = vpop.f32.mrb[4].mxu1 }
 0x5b0   :  { %v525_v6 = vadd.f32 %v524_v5, %v457_v1  ;;  %v1046_v7 = vpop.f32.mrb[5].mxu1 }
 0x5b2   :  { %1328 = vtanh.f32 %v525_v6 }
 0x5bc   :  { %v1329_v8 = vpop.eup %1328 }
 0x5bd   :  { %v529_v9 = vsub.f32 %v1329_v8, %v455_v4 }
 0x5bf   :  { %v530_v10 = vmul.f32 0.6, %v529_v9 }
 0x5c1   :  { %v531_v11 = vadd.f32 %v530_v10, %v455_v4 }
 0x5c3   :  { %1080 = vmatmul.mubr.f32.vlgmr.msra.gmra.mrb[6].mxu0 %v531_v11 }
 0x696   :  { %v600_v13 = vpop.f32.mrb[6].mxu0 }
 0x697   :  { %v601_v14 = vadd.f32 %v600_v13, %v533_v12  ;;  %v1081_v15 = vpop.f32.mrb[7].mxu0 }
 0x699   :  { %1330 = vtanh.f32 %v601_v14 }
 0x6a3   :  { %v1331_v16 = vpop.eup %1330 }
 0x6a4   :  { %v605_v17 = vsub.f32 %v1331_v16, %v531_v11 }
 0x6a6   :  { %v606_v0 = vmul.f32 0.6, %v605_v17 }
 0x6a8   :  { %v607_v18 = vadd.f32 %v606_v0, %v531_v11 }
 0x6aa   :  { %1115 = vmatmul.mubr.f32.vlgmr.msra.gmra.mrb[6].mxu1 %v607_v18 }
 0x77d   :  { %v676_v20 = vpop.f32.mrb[6].mxu1 }
 0x77e   :  { %v677_v21 = vadd.f32 %v676_v20, %v609_v19  ;;  %v1116_v22 = vpop.f32.mrb[7].mxu1 }
 0x780   :  { %1332 = vtanh.f32 %v677_v21 }
 0x78a   :  { %v1333_v23 = vpop.eup %1332 }
 0x78b   :  { %v681_v24 = vsub.f32 %v1333_v23, %v607_v18 }
 0x78d   :  { %v682_v25 = vmul.f32 0.6, %v681_v24 }
 0x78f   :  { %v683_v26 = vadd.f32 %v682_v25, %v607_v18 }
 0x791   :  { %684 = vst [vmem:[#allocation8] sm:$0xff] %v683_v26 }
 0x792   :  { %1411 = shalt.err (!%p1408_p0)
}
 0x793   :  { %s1412_s25 = scalar_lea.hbm %s1675_s3, 128 }
 0x794   :  { %p1413_p1 = scmp.ne.s32.totalorder %s1675_s3, %s1412_s25  ;;  %p1416_p2 = scmp.lt.u32.totalorder %s1412_s25, %s1675_s3 }
 0x796   :  { %p1418_p3 = pnand %p1416_p2, %p1413_p1 }
 0x798   :  { %1421 = shalt.err (!%p1418_p3)
}
 0x799   :  { %694 = dma.vmem_to_hbm [thread:$0]  %s692_s21, 128, %s1675_s3, [#allocation4]  }
 0x79a   :  { %1426 = dma.done.wait [#allocation4], 128  }
 0x79b   :  { %1427 = vsyncadd [#allocation4], 4294967168 }
 0x79c   :  { %698 = vsyncpa [#allocation3], 1 }
 0x79d   :  { %699 = vsyncpa [#allocation6], 1 }
 0x79e   :  { %700 = vsyncpa [#allocation4], 1 }

// kernel: tpu_custom_call.1
= control target key start
LH: loop header
LB: loop body
LE: loop exit
PB: predicated region body
PF: predicated region fallthrough
CT: control target
= control target key end

     0   :  { %8 = vsyncpa [#allocation3], 0  ;;  %s1672_s0 = inlined_call_operand.hbm [shape: f32[8,8,128], index: 0, kind: input, shape index: {}]   ;;  %s1673_s1 = inlined_call_operand.hbm [shape: f32[8,128], index: 1, kind: input, shape index: {}]   ;;  %s1674_s2 = inlined_call_operand.hbm [shape: f32[128,128], index: 2, kind: input, shape index: {}]   ;;  %s1675_s3 = inlined_call_operand.hbm [shape: f32[8,128], index: 3, kind: output, shape index: {}]  }
   0x1   :  { %9 = vsyncpa [#allocation6], 0 }
   0x2   :  { %10 = vsyncpa [#allocation4], 0  ;;  %s1428_s12 = smov [#allocation5]   ;;  %s1429_s14 = smov [#allocation2]  }
   0x3   :  { %s29_s13 = sshll.u32 %s1428_s12, 4  ;;  %s16_s15 = sshll.u32 %s1429_s14, 4  ;;  %s30_s13 = int_to_ptr.vmem [resolvable:$true] %s29_s13  ;;  %s1457_s15 = int_to_ptr.vmem [resolvable:$true] %s16_s15 }
   0x4   :  { %s1334_s18 = scalar_lea.hbm %s1673_s1, 128 }
   0x5   :  { %p1335_p0 = scmp.ne.s32.totalorder %s1673_s1, %s1334_s18  ;;  %p1338_p1 = scmp.lt.u32.totalorder %s1334_s18, %s1673_s1 }
   0x7   :  { %p1340_p2 = pnand %p1338_p1, %p1335_p0 }
   0x9   :  { %1343 = shalt.err (!%p1340_p2)
}
   0xa   :  { %s1344_s23 = scalar_lea.vmem %s30_s13, 128  ;;  %p1349_p4 = scmp.lt.s32.totalorder %s30_s13, %s30_s13 }
   0xb   :  { %p1345_p3 = scmp.ne.s32.totalorder %s30_s13, %s1344_s23  ;;  %p1350_p5 = scmp.lt.s32.totalorder %s1344_s23, %s1344_s23 }
   0xd   :  { %p1351_p6 = por %p1350_p5, %p1349_p4 }
   0xf   :  { %p1352_p7 = pnand %p1351_p6, %p1345_p3 }
  0x11   :  { %1355 = shalt.err (!%p1352_p7)
}
  0x12   :  { %32 = dma.hbm_to_vmem [thread:$0]  %s1673_s1, 128, %s30_s13, [#allocation6]  }
  0x13   :  { %s1356_s28 = scalar_lea.hbm %s1672_s0, 1024 }
  0x14   :  { %p1357_p8 = scmp.ne.s32.totalorder %s1672_s0, %s1356_s28  ;;  %p1360_p9 = scmp.lt.u32.totalorder %s1356_s28, %s1672_s0 }
  0x16   :  { %p1362_p10 = pnand %p1360_p9, %p1357_p8 }
  0x18   :  { %1365 = shalt.err (!%p1362_p10)
}
  0x19   :  { %s1366_s6 = scalar_lea.vmem %s1457_s15, 1024  ;;  %p1371_p12 = scmp.lt.s32.totalorder %s1457_s15, %s1457_s15 }
  0x1a   :  { %p1367_p11 = scmp.ne.s32.totalorder %s1457_s15, %s1366_s6  ;;  %p1372_p13 = scmp.lt.s32.totalorder %s1366_s6, %s1366_s6 }
  0x1c   :  { %p1373_p0 = por %p1372_p13, %p1371_p12 }
  0x1e   :  { %p1374_p1 = pnand %p1373_p0, %p1367_p11 }
  0x20   :  { %1377 = shalt.err (!%p1374_p1)
}
  0x21   :  { %s1430_s1 = smov 128   ;;  %s1431_s7 = smov 8  }
  0x22   :  { %22 = dma.hbm_to_vmem [thread:$0]  %s1672_s0, 1024, %s1457_s15, [#allocation3], %s1430_s1, %s1430_s1, %s1431_s7  }
  0x23   :  { %s1432_s10 = smov [#allocation7]   ;;  %s1378_s14 = scalar_lea.hbm %s1674_s2, 2048 }
  0x24   :  { %s38_s11 = sshll.u32 %s1432_s10, 4  ;;  %p1379_p2 = scmp.ne.s32.totalorder %s1674_s2, %s1378_s14  ;;  %s39_s11 = int_to_ptr.vmem [resolvable:$true] %s38_s11 }
  0x25   :  { %p1382_p3 = scmp.lt.u32.totalorder %s1378_s14, %s1674_s2 }
  0x27   :  { %p1384_p4 = pnand %p1382_p3, %p1379_p2 }
  0x29   :  { %1387 = shalt.err (!%p1384_p4)
}
  0x2a   :  { %s1388_s20 = scalar_lea.vmem %s39_s11, 2048  ;;  %p1393_p6 = scmp.lt.s32.totalorder %s39_s11, %s39_s11 }
  0x2b   :  { %p1389_p5 = scmp.ne.s32.totalorder %s39_s11, %s1388_s20  ;;  %p1394_p7 = scmp.lt.s32.totalorder %s1388_s20, %s1388_s20 }
  0x2d   :  { %p1395_p8 = por %p1394_p7, %p1393_p6 }
  0x2f   :  { %p1396_p9 = pnand %p1395_p8, %p1389_p5 }
  0x31   :  { %1399 = shalt.err (!%p1396_p9)
}
  0x32   :  { %44 = dma.hbm_to_vmem [thread:$0]  %s1674_s2, 2048, %s39_s11, [#allocation6], %s1430_s1, %s1430_s1, %s1431_s7  }
  0x33   :  { %1422 = dma.done.wait [#allocation3], 1024  }
  0x34   :  { %1423 = vsyncadd [#allocation3], 4294966272 }
  0x35   :  { %1424 = dma.done.wait [#allocation6], 2176  }
  0x36   :  { %1425 = vsyncadd [#allocation6], 4294965120  ;;  %v1433_v0 = vmov 0.0|0.0   ;;  %vm1434_vm0 = vmmov 0   ;;  %v1435_v1 = vmov 0.0   ;;  %v60_v2 = vld [vmem:[#allocation7] sm:$0xff] }
  0x37   :  { %1117 = vmatprep.subr.bf16.mxu0 %v1433_v0  ;;  %869 = vmatprep.mubr.msk.f32.mxu0 %vm1434_vm0, %v1435_v1  ;;  %v61_v3 = vld [vmem:[#allocation7 + $0x8] sm:$0xff]  ;;  %v62_v4 = vld [vmem:[#allocation7 + $0x10] sm:$0xff]  ;;  %v63_v6 = vld [vmem:[#allocation7 + $0x18] sm:$0xff]  ;;  %s1436_s2 = smov [#allocation8]  }
  0x38   :  { %1141 = vmatprep.subr.bf16.mxu1 %v1433_v0  ;;  %904 = vmatprep.mubr.msk.f32.mxu1 %vm1434_vm0, %v1435_v1  ;;  %v1506_v5 = vpack.c.bf16 %v61_v3, %v60_v2  ;;  %v1509_v7 = vpack.c.bf16 %v63_v6, %v62_v4  ;;  %v64_v8 = vld [vmem:[#allocation7 + $0x20] sm:$0xff]  ;;  %v65_v9 = vld [vmem:[#allocation7 + $0x28] sm:$0xff]  ;;  %v66_v11 = vld [vmem:[#allocation7 + $0x30] sm:$0xff]  ;;  %s691_s21 = sshll.u32 %s1436_s2, 4  ;;  %s692_s21 = int_to_ptr.vmem [resolvable:$true] %s691_s21 }
  0x39   :  { %v1515_v10 = vpack.c.bf16 %v65_v9, %v64_v8  ;;  %v67_v12 = vld [vmem:[#allocation7 + $0x38] sm:$0xff]  ;;  %v68_v14 = vld [vmem:[#allocation7 + $0x40] sm:$0xff]  ;;  %v69_v15 = vld [vmem:[#allocation7 + $0x48] sm:$0xff]  ;;  %s1400_s22 = scalar_lea.vmem %s692_s21, 128  ;;  %p1405_p11 = scmp.lt.s32.totalorder %s692_s21, %s692_s21 }
  0x3a   :  { %1119 = vmatpush3.bf16.msra.mxu0 %v1506_v5  ;;  %1143 = vmatpush3.bf16.msra.mxu1 %v1506_v5  ;;  %v1521_v13 = vpack.c.bf16 %v67_v12, %v66_v11  ;;  %v1527_v16 = vpack.c.bf16 %v69_v15, %v68_v14  ;;  %v70_v17 = vld [vmem:[#allocation7 + $0x50] sm:$0xff]  ;;  %v71_v18 = vld [vmem:[#allocation7 + $0x58] sm:$0xff]  ;;  %v72_v20 = vld [vmem:[#allocation7 + $0x60] sm:$0xff]  ;;  %p1401_p10 = scmp.ne.s32.totalorder %s692_s21, %s1400_s22  ;;  %p1406_p12 = scmp.lt.s32.totalorder %s1400_s22, %s1400_s22 }
  0x3b   :  { %1120 = vmatprep.subr.bf16.mxu0 %v1433_v0  ;;  %1144 = vmatprep.subr.bf16.mxu1 %v1433_v0  ;;  %v1533_v19 = vpack.c.bf16 %v71_v18, %v70_v17  ;;  %v73_v21 = vld [vmem:[#allocation7 + $0x68] sm:$0xff]  ;;  %v74_v23 = vld [vmem:[#allocation7 + $0x70] sm:$0xff]  ;;  %v75_v24 = vld [vmem:[#allocation7 + $0x78] sm:$0xff] }
  0x3c   :  { %v1539_v22 = vpack.c.bf16 %v73_v21, %v72_v20  ;;  %v1545_v25 = vpack.c.bf16 %v75_v24, %v74_v23  ;;  %v58_v26 = vld [vmem:[#allocation5] sm:$0xff]  ;;  %v153_v35 = vld [vmem:[#allocation2 + $0x8] sm:$0xff]  ;;  %v229_v43 = vld [vmem:[#allocation2 + $0x10] sm:$0xff]  ;;  %p1407_p13 = por %p1406_p12, %p1405_p11 }
  0x3d   :  { %v77_v27 = vld [vmem:[#allocation2] sm:$0xff]  ;;  %v305_v51 = vld [vmem:[#allocation2 + $0x18] sm:$0xff]  ;;  %v533_v12 = vld [vmem:[#allocation2 + $0x30] sm:$0xff] }
  0x3e   :  { %1122 = vmatpush3.bf16.msra.mxu0 %v1509_v7  ;;  %1146 = vmatpush3.bf16.msra.mxu1 %v1509_v7  ;;  %v381_v59 = vld [vmem:[#allocation2 + $0x20] sm:$0xff]  ;;  %p1408_p0 = pnand %p1407_p13, %p1401_p10 }
  0x3f   :  { %1123 = vmatprep.subr.bf16.mxu0 %v1433_v0  ;;  %1147 = vmatprep.subr.bf16.mxu1 %v1433_v0 }
  0x42   :  { %1125 = vmatpush3.bf16.msra.mxu0 %v1515_v10  ;;  %1149 = vmatpush3.bf16.msra.mxu1 %v1515_v10 }
  0x43   :  { %1126 = vmatprep.subr.bf16.mxu0 %v1433_v0  ;;  %1150 = vmatprep.subr.bf16.mxu1 %v1433_v0 }
  0x46   :  { %1128 = vmatpush3.bf16.msra.mxu0 %v1521_v13  ;;  %1152 = vmatpush3.bf16.msra.mxu1 %v1521_v13 }
  0x47   :  { %1129 = vmatprep.subr.bf16.mxu0 %v1433_v0  ;;  %1153 = vmatprep.subr.bf16.mxu1 %v1433_v0 }
  0x4a   :  { %1131 = vmatpush3.bf16.msra.mxu0 %v1527_v16  ;;  %1155 = vmatpush3.bf16.msra.mxu1 %v1527_v16 }
  0x4b   :  { %1132 = vmatprep.subr.bf16.mxu0 %v1433_v0  ;;  %1156 = vmatprep.subr.bf16.mxu1 %v1433_v0 }
  0x4e   :  { %1134 = vmatpush3.bf16.msra.mxu0 %v1533_v19  ;;  %1158 = vmatpush3.bf16.msra.mxu1 %v1533_v19 }
  0x4f   :  { %1135 = vmatprep.subr.bf16.mxu0 %v1433_v0  ;;  %1159 = vmatprep.subr.bf16.mxu1 %v1433_v0 }
  0x52   :  { %1137 = vmatpush3.bf16.msra.mxu0 %v1539_v22  ;;  %1161 = vmatpush3.bf16.msra.mxu1 %v1539_v22 }
  0x53   :  { %1138 = vmatprep.subr.bf16.mxu0 %v1433_v0  ;;  %1162 = vmatprep.subr.bf16.mxu1 %v1433_v0 }
  0x56   :  { %1140 = vmatpush3.bf16.msra.mxu0 %v1545_v25  ;;  %1164 = vmatpush3.bf16.msra.mxu1 %v1545_v25 }
  0x57   :  { %1165 = vmatprep.subr.bf16.mxu0 %v1433_v0  ;;  %1189 = vmatprep.subr.bf16.mxu1 %v1433_v0 }
  0x59   :  { %870 = vmatmul.mubr.f32.vlgmr.msra.gmra.mrb[0].mxu0 %v58_v26 }
  0x5a   :  { %1167 = vmatpush3.bf16.msra.mxu0 %v1506_v5  ;;  %939 = vmatprep.mubr.msk.f32.mxu0 %vm1434_vm0, %v1435_v1 }
  0x5b   :  { %1168 = vmatprep.subr.bf16.mxu0 %v1433_v0 }
  0x5e   :  { %1170 = vmatpush3.bf16.msra.mxu0 %v1509_v7 }
  0x5f   :  { %1171 = vmatprep.subr.bf16.mxu0 %v1433_v0 }
  0x62   :  { %1173 = vmatpush3.bf16.msra.mxu0 %v1515_v10 }
  0x63   :  { %1174 = vmatprep.subr.bf16.mxu0 %v1433_v0 }
  0x66   :  { %1176 = vmatpush3.bf16.msra.mxu0 %v1521_v13 }
  0x67   :  { %1177 = vmatprep.subr.bf16.mxu0 %v1433_v0 }
  0x6a   :  { %1179 = vmatpush3.bf16.msra.mxu0 %v1527_v16 }
  0x6b   :  { %1180 = vmatprep.subr.bf16.mxu0 %v1433_v0 }
  0x6e   :  { %1182 = vmatpush3.bf16.msra.mxu0 %v1533_v19 }
  0x6f   :  { %1183 = vmatprep.subr.bf16.mxu0 %v1433_v0 }
  0x72   :  { %1185 = vmatpush3.bf16.msra.mxu0 %v1539_v22 }
  0x73   :  { %1186 = vmatprep.subr.bf16.mxu0 %v1433_v0 }
  0x76   :  { %1188 = vmatpush3.bf16.msra.mxu0 %v1545_v25 }
  0x77   :  { %1213 = vmatprep.subr.bf16.mxu0 %v1433_v0 }
 0x12c   :  { %v144_v28 = vpop.f32.mrb[0].mxu0 }
 0x12d   :  { %v145_v29 = vadd.f32 %v144_v28, %v77_v27  ;;  %v871_v30 = vpop.f32.mrb[1].mxu0 }
 0x12f   :  { %1318 = vtanh.f32 %v145_v29 }
 0x139   :  { %v1319_v31 = vpop.eup %1318 }
 0x13a   :  { %v149_v32 = vsub.f32 %v1319_v31, %v58_v26 }
 0x13c   :  { %v150_v33 = vmul.f32 0.6, %v149_v32 }
 0x13e   :  { %v151_v34 = vadd.f32 %v150_v33, %v58_v26 }
 0x140   :  { %905 = vmatmul.mubr.f32.vlgmr.msra.gmra.mrb[0].mxu1 %v151_v34 }
 0x141   :  { %1191 = vmatpush3.bf16.msra.mxu1 %v1506_v5  ;;  %974 = vmatprep.mubr.msk.f32.mxu1 %vm1434_vm0, %v1435_v1 }
 0x142   :  { %1192 = vmatprep.subr.bf16.mxu1 %v1433_v0 }
 0x145   :  { %1194 = vmatpush3.bf16.msra.mxu1 %v1509_v7 }
 0x146   :  { %1195 = vmatprep.subr.bf16.mxu1 %v1433_v0 }
 0x149   :  { %1197 = vmatpush3.bf16.msra.mxu1 %v1515_v10 }
 0x14a   :  { %1198 = vmatprep.subr.bf16.mxu1 %v1433_v0 }
 0x14d   :  { %1200 = vmatpush3.bf16.msra.mxu1 %v1521_v13 }
 0x14e   :  { %1201 = vmatprep.subr.bf16.mxu1 %v1433_v0 }
 0x151   :  { %1203 = vmatpush3.bf16.msra.mxu1 %v1527_v16 }
 0x152   :  { %1204 = vmatprep.subr.bf16.mxu1 %v1433_v0 }
 0x155   :  { %1206 = vmatpush3.bf16.msra.mxu1 %v1533_v19 }
 0x156   :  { %1207 = vmatprep.subr.bf16.mxu1 %v1433_v0 }
 0x159   :  { %1209 = vmatpush3.bf16.msra.mxu1 %v1539_v22 }
 0x15a   :  { %1210 = vmatprep.subr.bf16.mxu1 %v1433_v0 }
 0x15d   :  { %1212 = vmatpush3.bf16.msra.mxu1 %v1545_v25 }
 0x15e   :  { %1237 = vmatprep.subr.bf16.mxu1 %v1433_v0 }
 0x213   :  { %v220_v36 = vpop.f32.mrb[0].mxu1 }
 0x214   :  { %v221_v37 = vadd.f32 %v220_v36, %v153_v35  ;;  %v906_v38 = vpop.f32.mrb[1].mxu1 }
 0x216   :  { %1320 = vtanh.f32 %v221_v37 }
 0x220   :  { %v1321_v39 = vpop.eup %1320 }
 0x221   :  { %v225_v40 = vsub.f32 %v1321_v39, %v151_v34 }
 0x223   :  { %v226_v41 = vmul.f32 0.6, %v225_v40 }
 0x225   :  { %v227_v42 = vadd.f32 %v226_v41, %v151_v34 }
 0x227   :  { %940 = vmatmul.mubr.f32.vlgmr.msra.gmra.mrb[2].mxu0 %v227_v42 }
 0x228   :  { %1215 = vmatpush3.bf16.msra.mxu0 %v1506_v5  ;;  %1009 = vmatprep.mubr.msk.f32.mxu0 %vm1434_vm0, %v1435_v1 }
 0x229   :  { %1216 = vmatprep.subr.bf16.mxu0 %v1433_v0 }
 0x22c   :  { %1218 = vmatpush3.bf16.msra.mxu0 %v1509_v7 }
 0x22d   :  { %1219 = vmatprep.subr.bf16.mxu0 %v1433_v0 }
 0x230   :  { %1221 = vmatpush3.bf16.msra.mxu0 %v1515_v10 }
 0x231   :  { %1222 = vmatprep.subr.bf16.mxu0 %v1433_v0 }
 0x234   :  { %1224 = vmatpush3.bf16.msra.mxu0 %v1521_v13 }
 0x235   :  { %1225 = vmatprep.subr.bf16.mxu0 %v1433_v0 }
 0x238   :  { %1227 = vmatpush3.bf16.msra.mxu0 %v1527_v16 }
 0x239   :  { %1228 = vmatprep.subr.bf16.mxu0 %v1433_v0 }
 0x23c   :  { %1230 = vmatpush3.bf16.msra.mxu0 %v1533_v19 }
 0x23d   :  { %1231 = vmatprep.subr.bf16.mxu0 %v1433_v0 }
 0x240   :  { %1233 = vmatpush3.bf16.msra.mxu0 %v1539_v22 }
 0x241   :  { %1234 = vmatprep.subr.bf16.mxu0 %v1433_v0 }
 0x244   :  { %1236 = vmatpush3.bf16.msra.mxu0 %v1545_v25 }
 0x245   :  { %1261 = vmatprep.subr.bf16.mxu0 %v1433_v0 }
 0x2fa   :  { %v296_v44 = vpop.f32.mrb[2].mxu0 }
 0x2fb   :  { %v297_v45 = vadd.f32 %v296_v44, %v229_v43  ;;  %v941_v46 = vpop.f32.mrb[3].mxu0 }
 0x2fd   :  { %1322 = vtanh.f32 %v297_v45 }
 0x307   :  { %v1323_v47 = vpop.eup %1322 }
 0x308   :  { %v301_v48 = vsub.f32 %v1323_v47, %v227_v42 }
 0x30a   :  { %v302_v49 = vmul.f32 0.6, %v301_v48 }
 0x30c   :  { %v303_v50 = vadd.f32 %v302_v49, %v227_v42 }
 0x30e   :  { %975 = vmatmul.mubr.f32.vlgmr.msra.gmra.mrb[2].mxu1 %v303_v50 }
 0x30f   :  { %1239 = vmatpush3.bf16.msra.mxu1 %v1506_v5  ;;  %1044 = vmatprep.mubr.msk.f32.mxu1 %vm1434_vm0, %v1435_v1 }
 0x310   :  { %1240 = vmatprep.subr.bf16.mxu1 %v1433_v0 }
 0x313   :  { %1242 = vmatpush3.bf16.msra.mxu1 %v1509_v7 }
 0x314   :  { %1243 = vmatprep.subr.bf16.mxu1 %v1433_v0 }
 0x317   :  { %1245 = vmatpush3.bf16.msra.mxu1 %v1515_v10 }
 0x318   :  { %1246 = vmatprep.subr.bf16.mxu1 %v1433_v0 }
 0x31b   :  { %1248 = vmatpush3.bf16.msra.mxu1 %v1521_v13 }
 0x31c   :  { %1249 = vmatprep.subr.bf16.mxu1 %v1433_v0 }
 0x31f   :  { %1251 = vmatpush3.bf16.msra.mxu1 %v1527_v16 }
 0x320   :  { %1252 = vmatprep.subr.bf16.mxu1 %v1433_v0 }
 0x323   :  { %1254 = vmatpush3.bf16.msra.mxu1 %v1533_v19 }
 0x324   :  { %1255 = vmatprep.subr.bf16.mxu1 %v1433_v0 }
 0x327   :  { %1257 = vmatpush3.bf16.msra.mxu1 %v1539_v22 }
 0x328   :  { %1258 = vmatprep.subr.bf16.mxu1 %v1433_v0 }
 0x32b   :  { %1260 = vmatpush3.bf16.msra.mxu1 %v1545_v25 }
 0x32c   :  { %1285 = vmatprep.subr.bf16.mxu1 %v1433_v0 }
 0x3e1   :  { %v372_v52 = vpop.f32.mrb[2].mxu1 }
 0x3e2   :  { %v373_v53 = vadd.f32 %v372_v52, %v305_v51  ;;  %v976_v54 = vpop.f32.mrb[3].mxu1 }
 0x3e4   :  { %1324 = vtanh.f32 %v373_v53 }
 0x3ee   :  { %v1325_v55 = vpop.eup %1324 }
 0x3ef   :  { %v377_v56 = vsub.f32 %v1325_v55, %v303_v50 }
 0x3f1   :  { %v378_v57 = vmul.f32 0.6, %v377_v56 }
 0x3f3   :  { %v379_v58 = vadd.f32 %v378_v57, %v303_v50 }
 0x3f5   :  { %1010 = vmatmul.mubr.f32.vlgmr.msra.gmra.mrb[4].mxu0 %v379_v58 }
 0x3f6   :  { %1263 = vmatpush3.bf16.msra.mxu0 %v1506_v5  ;;  %1079 = vmatprep.mubr.msk.f32.mxu0 %vm1434_vm0, %v1435_v1 }
 0x3f7   :  { %1264 = vmatprep.subr.bf16.mxu0 %v1433_v0 }
 0x3fa   :  { %1266 = vmatpush3.bf16.msra.mxu0 %v1509_v7 }
 0x3fb   :  { %1267 = vmatprep.subr.bf16.mxu0 %v1433_v0 }
 0x3fe   :  { %1269 = vmatpush3.bf16.msra.mxu0 %v1515_v10 }
 0x3ff   :  { %1270 = vmatprep.subr.bf16.mxu0 %v1433_v0 }
 0x402   :  { %1272 = vmatpush3.bf16.msra.mxu0 %v1521_v13 }
 0x403   :  { %1273 = vmatprep.subr.bf16.mxu0 %v1433_v0 }
 0x406   :  { %1275 = vmatpush3.bf16.msra.mxu0 %v1527_v16 }
 0x407   :  { %1276 = vmatprep.subr.bf16.mxu0 %v1433_v0 }
 0x40a   :  { %1278 = vmatpush3.bf16.msra.mxu0 %v1533_v19 }
 0x40b   :  { %1279 = vmatprep.subr.bf16.mxu0 %v1433_v0 }
 0x40e   :  { %1281 = vmatpush3.bf16.msra.mxu0 %v1539_v22 }
 0x40f   :  { %1282 = vmatprep.subr.bf16.mxu0 %v1433_v0 }
 0x412   :  { %1284 = vmatpush3.bf16.msra.mxu0 %v1545_v25 }
 0x4c8   :  { %v448_v60 = vpop.f32.mrb[4].mxu0 }
 0x4c9   :  { %v449_v61 = vadd.f32 %v448_v60, %v381_v59  ;;  %v1011_v62 = vpop.f32.mrb[5].mxu0 }
 0x4cb   :  { %1326 = vtanh.f32 %v449_v61 }
 0x4d5   :  { %v1327_v63 = vpop.eup %1326 }
 0x4d6   :  { %v453_v2 = vsub.f32 %v1327_v63, %v379_v58 }
 0x4d8   :  { %v454_v3 = vmul.f32 0.6, %v453_v2 }
 0x4da   :  { %v455_v4 = vadd.f32 %v454_v3, %v379_v58 }
 0x4dc   :  { %1045 = vmatmul.mubr.f32.vlgmr.msra.gmra.mrb[4].mxu1 %v455_v4 }
 0x4dd   :  { %1287 = vmatpush3.bf16.msra.mxu1 %v1506_v5  ;;  %1114 = vmatprep.mubr.msk.f32.mxu1 %vm1434_vm0, %v1435_v1  ;;  %v457_v1 = vld [vmem:[#allocation2 + $0x28] sm:$0xff] }
 0x4de   :  { %1288 = vmatprep.subr.bf16.mxu1 %v1433_v0 }
 0x4e1   :  { %1290 = vmatpush3.bf16.msra.mxu1 %v1509_v7 }
 0x4e2   :  { %1291 = vmatprep.subr.bf16.mxu1 %v1433_v0 }
 0x4e5   :  { %1293 = vmatpush3.bf16.msra.mxu1 %v1515_v10 }
 0x4e6   :  { %1294 = vmatprep.subr.bf16.mxu1 %v1433_v0 }
 0x4e9   :  { %1296 = vmatpush3.bf16.msra.mxu1 %v1521_v13 }
 0x4ea   :  { %1297 = vmatprep.subr.bf16.mxu1 %v1433_v0 }
 0x4ed   :  { %1299 = vmatpush3.bf16.msra.mxu1 %v1527_v16 }
 0x4ee   :  { %1300 = vmatprep.subr.bf16.mxu1 %v1433_v0 }
 0x4f1   :  { %1302 = vmatpush3.bf16.msra.mxu1 %v1533_v19  ;;  %v609_v19 = vld [vmem:[#allocation2 + $0x38] sm:$0xff] }
 0x4f2   :  { %1303 = vmatprep.subr.bf16.mxu1 %v1433_v0 }
 0x4f5   :  { %1305 = vmatpush3.bf16.msra.mxu1 %v1539_v22 }
 0x4f6   :  { %1306 = vmatprep.subr.bf16.mxu1 %v1433_v0 }
 0x4f9   :  { %1308 = vmatpush3.bf16.msra.mxu1 %v1545_v25 }
 0x5af   :  { %v524_v5 = vpop.f32.mrb[4].mxu1 }
 0x5b0   :  { %v525_v6 = vadd.f32 %v524_v5, %v457_v1  ;;  %v1046_v7 = vpop.f32.mrb[5].mxu1 }
 0x5b2   :  { %1328 = vtanh.f32 %v525_v6 }
 0x5bc   :  { %v1329_v8 = vpop.eup %1328 }
 0x5bd   :  { %v529_v9 = vsub.f32 %v1329_v8, %v455_v4 }
 0x5bf   :  { %v530_v10 = vmul.f32 0.6, %v529_v9 }
 0x5c1   :  { %v531_v11 = vadd.f32 %v530_v10, %v455_v4 }
 0x5c3   :  { %1080 = vmatmul.mubr.f32.vlgmr.msra.gmra.mrb[6].mxu0 %v531_v11 }
 0x696   :  { %v600_v13 = vpop.f32.mrb[6].mxu0 }
 0x697   :  { %v601_v14 = vadd.f32 %v600_v13, %v533_v12  ;;  %v1081_v15 = vpop.f32.mrb[7].mxu0 }
 0x699   :  { %1330 = vtanh.f32 %v601_v14 }
 0x6a3   :  { %v1331_v16 = vpop.eup %1330 }
 0x6a4   :  { %v605_v17 = vsub.f32 %v1331_v16, %v531_v11 }
 0x6a6   :  { %v606_v0 = vmul.f32 0.6, %v605_v17 }
 0x6a8   :  { %v607_v18 = vadd.f32 %v606_v0, %v531_v11 }
 0x6aa   :  { %1115 = vmatmul.mubr.f32.vlgmr.msra.gmra.mrb[6].mxu1 %v607_v18 }
 0x77d   :  { %v676_v20 = vpop.f32.mrb[6].mxu1 }
 0x77e   :  { %v677_v21 = vadd.f32 %v676_v20, %v609_v19  ;;  %v1116_v22 = vpop.f32.mrb[7].mxu1 }
 0x780   :  { %1332 = vtanh.f32 %v677_v21 }
 0x78a   :  { %v1333_v23 = vpop.eup %1332 }
 0x78b   :  { %v681_v24 = vsub.f32 %v1333_v23, %v607_v18 }
 0x78d   :  { %v682_v25 = vmul.f32 0.6, %v681_v24 }
 0x78f   :  { %v683_v26 = vadd.f32 %v682_v25, %v607_v18 }
 0x791   :  { %684 = vst [vmem:[#allocation8] sm:$0xff] %v683_v26 }
 0x792   :  { %1411 = shalt.err (!%p1408_p0)
}
 0x793   :  { %s1412_s25 = scalar_lea.hbm %s1675_s3, 128 }
 0x794   :  { %p1413_p1 = scmp.ne.s32.totalorder %s1675_s3, %s1412_s25  ;;  %p1416_p2 = scmp.lt.u32.totalorder %s1412_s25, %s1675_s3 }
 0x796   :  { %p1418_p3 = pnand %p1416_p2, %p1413_p1 }
 0x798   :  { %1421 = shalt.err (!%p1418_p3)
}
 0x799   :  { %694 = dma.vmem_to_hbm [thread:$0]  %s692_s21, 128, %s1675_s3, [#allocation4]  }
 0x79a   :  { %1426 = dma.done.wait [#allocation4], 128  }
 0x79b   :  { %1427 = vsyncadd [#allocation4], 4294967168 }
 0x79c   :  { %698 = vsyncpa [#allocation3], 1 }
 0x79d   :  { %699 = vsyncpa [#allocation6], 1 }
 0x79e   :  { %700 = vsyncpa [#allocation4], 1 }

</bundles_post_ra>
